<compile_context>
chip_gen: v5e
topology: v5e:2x2
jax: 0.10.0
libtpu: 0.0.40
codegen_flags: <defaults>
</compile_context>

<pallas_src>
import functools

import jax
import jax.numpy as jnp
from jax import lax
from jax.experimental import pallas as pl
from jax.experimental.pallas import tpu as pltpu


def _round_up(x, m):
    return (x + m - 1) // m * m


def _vmem_limit(est_bytes):
    # Derive the scoped-VMEM request from actual buffer sizes (+50% headroom for
    # Mosaic-internal scratch) instead of a fixed 48 MiB.
    return int(min(max(1.5 * est_bytes, 24 * 2**20), 100 * 2**20))


def _fold_bn(params, eps=1e-5):
    """Fold inference BatchNorm into conv1: returns (scaled OIHW weights, shift)."""
    scale = params["gamma"] / jnp.sqrt(params["running_var"] + eps)
    w1_f = params["w1"] * scale[:, None, None, None]          # (Cmid, Cin, 3, 3)
    shift = params["beta"] - params["running_mean"] * scale   # (Cmid,)
    return w1_f, shift


# ---------------------------------------------------------------------------
# Small-Cin path: 3x3 window packed into the contraction dim (K = 9*Cin).
# ---------------------------------------------------------------------------
def _matmul_head_kernel(x_ref, w1_ref, shift_ref, w2_ref, b2_ref, o_ref):
    # conv3x3 (+ folded BN) as one matmul over K = 9*Cin, then ReLU, then the
    # 1x1 conv as a second matmul.  bf16 inputs, f32 accumulation, bf16 store.
    acc = jnp.dot(x_ref[...], w1_ref[...], preferred_element_type=jnp.float32)
    hid = jnp.maximum(acc + shift_ref[...], 0.0).astype(jnp.bfloat16)
    out = jnp.dot(hid, w2_ref[...], preferred_element_type=jnp.float32) + b2_ref[...]
    o_ref[...] = out.astype(o_ref.dtype)


def _forward_small_cin(x_nchw, params):
    N, Cin, H, W = x_nchw.shape
    Cmid = params["w1"].shape[0]
    Ccls = params["w2"].shape[0]
    Cpad = _round_up(Ccls, 128)        # lane-dense logits
    K = 9 * Cin
    Kp = _round_up(K, 8)

    P = N * H * W
    tm = min(1024, _round_up(P, 8))    # MXU M-dim per grid step
    P_pad = _round_up(P, tm)

    # im2col in the wrapper (cheap for small Cin): K index = (kh*3+kw)*Cin + ci.
    x_nhwc = jnp.transpose(x_nchw, (0, 2, 3, 1))
    xp = jnp.pad(x_nhwc, ((0, 0), (1, 1), (1, 1), (0, 0)))
    cols = [xp[:, kh:kh + H, kw:kw + W, :] for kh in range(3) for kw in range(3)]
    patches = jnp.concatenate(cols, axis=-1).reshape(P, K)
    patches = jnp.pad(patches, ((0, P_pad - P), (0, Kp - K))).astype(jnp.bfloat16)

    # BN folded into conv1; weight rows match the patch K layout.
    w1_f, shift = _fold_bn(params)
    w1_cols = jnp.transpose(w1_f, (2, 3, 1, 0)).reshape(K, Cmid)     # (kh,kw,ci) x co
    w1_cols = jnp.pad(w1_cols, ((0, Kp - K), (0, 0))).astype(jnp.bfloat16)
    shift = shift.reshape(1, Cmid).astype(jnp.float32)

    w2_mat = jnp.transpose(params["w2"].reshape(Ccls, Cmid), (1, 0))  # (Cmid, Ccls)
    w2_p = jnp.pad(w2_mat, ((0, 0), (0, Cpad - Ccls))).astype(jnp.bfloat16)
    b2_p = jnp.pad(params["b2"].reshape(1, Ccls),
                   ((0, 0), (0, Cpad - Ccls))).astype(jnp.float32)

    est = (2 * tm * Kp * 2 + 2 * tm * Cpad * 2
           + 2 * (Kp * Cmid + Cmid * Cpad + Cmid + Cpad) * 2
           + tm * (Cmid * 4 + Cmid * 2 + Cpad * 4))
    flops = 2 * P_pad * (Kp * Cmid + Cmid * Cpad)
    bytes_accessed = (P_pad * (Kp + Cpad) * 2
                      + (Kp * Cmid + Cmid * Cpad) * 2 + (Cmid + Cpad) * 4)

    out = pl.pallas_call(
        _matmul_head_kernel,
        out_shape=jax.ShapeDtypeStruct((P_pad, Cpad), jnp.bfloat16),
        grid=(P_pad // tm,),
        in_specs=[
            pl.BlockSpec((tm, Kp), lambda p: (p, 0)),        # packed patches
            pl.BlockSpec((Kp, Cmid), lambda p: (0, 0)),      # conv1 (BN folded)
            pl.BlockSpec((1, Cmid), lambda p: (0, 0)),       # BN shift
            pl.BlockSpec((Cmid, Cpad), lambda p: (0, 0)),    # conv2 weights
            pl.BlockSpec((1, Cpad), lambda p: (0, 0)),       # conv2 bias
        ],
        out_specs=pl.BlockSpec((tm, Cpad), lambda p: (p, 0)),
        compiler_params=pltpu.CompilerParams(
            dimension_semantics=("parallel",),
            vmem_limit_bytes=_vmem_limit(est)),
        cost_estimate=pl.CostEstimate(
            flops=flops, transcendentals=0, bytes_accessed=bytes_accessed),
    )(patches, w1_cols, shift, w2_p, b2_p)

    out = out[:P, :Ccls].astype(jnp.float32).reshape(N, H, W, Ccls)
    return jnp.transpose(out, (0, 3, 1, 2))


# ---------------------------------------------------------------------------
# Large-Cin path (ASPP-sized channels): halo'd H-tiles, manual DMA pipeline.
# ---------------------------------------------------------------------------
def _halo_head_kernel(x_hbm, w1_ref, shift_ref, w2_ref, b2_ref, o_ref,
                      xbuf, sem, *, th, wb, hp, n_tiles, cinp, cmid, cpad):
    n = pl.program_id(0)   # image index  ("parallel")
    i = pl.program_id(1)   # H-tile index ("arbitrary", carries the DMA pipeline)
    rows = (th + 2) * wb + 8                      # 8-row guard keeps tap slices in bounds
    base = pl.multiple_of((n * hp + i * th) * wb, 8)

    def tile_copy(row_start, slot):
        return pltpu.make_async_copy(
            x_hbm.at[pl.ds(row_start, rows)], xbuf.at[slot], sem.at[slot])

    # Prime this image's pipeline on its first tile.
    @pl.when(i == 0)
    def _():
        tile_copy(base, 0).start()

    slot = lax.rem(i, 2)
    tile_copy(base, slot).wait()                  # same src/dst/sem as the matching start()

    # Prefetch the next H-tile of this image while we compute on this one.
    @pl.when(i + 1 < n_tiles)
    def _():
        tile_copy(base + th * wb, 1 - slot).start()

    xt = xbuf[slot]                               # ((th+2)*wb + 8, cinp) bf16
    m = th * wb

    # 3x3 conv = 9 tap matmuls.  In the flat (row, channel) layout a (kh, kw)
    # tap is a plain row-offset slice (offset kh*wb + kw); wb % 8 == 0 keeps the
    # kw == 0 taps sublane aligned.  Rows/columns read past the valid window
    # only feed output columns >= W, which the wrapper discards.
    acc = jnp.zeros((m, cmid), jnp.float32)
    for kh in range(3):
        for kw in range(3):
            xs = xt[kh * wb + kw:kh * wb + kw + m, :]
            acc = acc + jnp.dot(xs, w1_ref[kh * 3 + kw],
                                preferred_element_type=jnp.float32)

    # Folded-BN shift + ReLU, then the 1x1 conv (classes padded to 128 lanes).
    hid = jnp.maximum(acc + shift_ref[...], 0.0).astype(jnp.bfloat16)
    out = jnp.dot(hid, w2_ref[...], preferred_element_type=jnp.float32) + b2_ref[...]
    o_ref[...] = out.reshape(th, wb, cpad).astype(o_ref.dtype)


def _pick_th(H, wb, cinp, cmid):
    # Fill the MXU M dimension (>= ~512 rows) and amortize the 2-row halo, but
    # keep the 2-slot input tile (~12 MiB) and f32 accumulator (~8 MiB) bounded.
    th = max(16, pl.cdiv(512, wb))
    th = min(th,
             max(4, (12 * 2**20) // (4 * wb * cinp) - 2),
             max(4, (8 * 2**20) // (4 * wb * cmid)))
    return max(1, min(th, _round_up(max(H, 1), 8)))


def _forward_large_cin(x_nchw, params, th=None):
    N, Cin, H, W = x_nchw.shape
    Cmid = params["w1"].shape[0]
    Ccls = params["w2"].shape[0]
    Cpad = _round_up(Ccls, 128)
    Cinp = _round_up(Cin, 128)
    Wb = _round_up(W + 2, 8)           # halo'd width; also the padded output width
    if th is None:
        th = _pick_th(H, Wb, Cinp, Cmid)
    H_pad = _round_up(H, th)
    Hp = H_pad + 2
    n_tiles = H_pad // th

    # NHWC, zero pad: 1-pixel halo + round-up, channels padded to 128 lanes,
    # plus an 8-row global guard so every tile DMA stays in bounds.
    x_nhwc = jnp.transpose(x_nchw, (0, 2, 3, 1))
    xp = jnp.pad(x_nhwc, ((0, 0), (1, Hp - H - 1), (1, Wb - W - 1), (0, Cinp - Cin)))
    x_flat = jnp.pad(xp.reshape(N * Hp * Wb, Cinp), ((0, 8), (0, 0))).astype(jnp.bfloat16)

    # Fold BN into conv1 weights; taps laid out as (9, Cinp, Cmid).
    w1_f, shift = _fold_bn(params)
    w1_t = jnp.transpose(w1_f, (2, 3, 1, 0))                        # (3,3,Cin,Cmid)
    w1_t = jnp.pad(w1_t, ((0, 0), (0, 0), (0, Cinp - Cin), (0, 0)))
    w1_taps = w1_t.reshape(9, Cinp, Cmid).astype(jnp.bfloat16)
    shift = shift.reshape(1, Cmid).astype(jnp.float32)

    w2_mat = jnp.transpose(params["w2"].reshape(Ccls, Cmid), (1, 0))
    w2_p = jnp.pad(w2_mat, ((0, 0), (0, Cpad - Ccls))).astype(jnp.bfloat16)
    b2_p = jnp.pad(params["b2"].reshape(1, Ccls),
                   ((0, 0), (0, Cpad - Ccls))).astype(jnp.float32)

    kernel = functools.partial(
        _halo_head_kernel, th=th, wb=Wb, hp=Hp, n_tiles=n_tiles,
        cinp=Cinp, cmid=Cmid, cpad=Cpad)

    xbuf_rows = (th + 2) * Wb + 8
    est = (2 * xbuf_rows * Cinp * 2                       # double-buffered halo tile
           + 2 * th * Wb * Cpad * 2                       # double-buffered output block
           + 2 * (9 * Cinp * Cmid + Cmid * Cpad + Cmid + Cpad) * 2
           + th * Wb * (Cmid * 4 + Cmid * 2 + Cpad * 4)   # acc / hid / out values
           + 2 * xbuf_rows * Cinp * 2)                    # shifted tap slices
    flops = 2 * N * H_pad * Wb * (9 * Cinp * Cmid + Cmid * Cpad)
    bytes_accessed = (N * Hp * Wb * Cinp * 2 + N * H_pad * Wb * Cpad * 2
                      + (9 * Cinp * Cmid + Cmid * Cpad) * 2 + (Cmid + Cpad) * 4)

    # NOTE: the image axis is the only "parallel" axis here (the tile axis
    # carries the DMA double-buffer), so a single image uses one v7x core.
    out = pl.pallas_call(
        kernel,
        out_shape=jax.ShapeDtypeStruct((N * H_pad, Wb, Cpad), jnp.bfloat16),
        grid=(N, n_tiles),
        in_specs=[
            pl.BlockSpec(memory_space=pl.ANY),                        # input (manual halo DMA)
            pl.BlockSpec((9, Cinp, Cmid), lambda n, i: (0, 0, 0)),    # conv1 taps (BN folded)
            pl.BlockSpec((1, Cmid), lambda n, i: (0, 0)),             # BN shift
            pl.BlockSpec((Cmid, Cpad), lambda n, i: (0, 0)),          # conv2 weights
            pl.BlockSpec((1, Cpad), lambda n, i: (0, 0)),             # conv2 bias
        ],
        out_specs=pl.BlockSpec((th, Wb, Cpad), lambda n, i: (n * n_tiles + i, 0, 0)),
        scratch_shapes=[
            pltpu.VMEM((2, xbuf_rows, Cinp), jnp.bfloat16),           # 2-slot halo tile
            pltpu.SemaphoreType.DMA((2,)),
        ],
        compiler_params=pltpu.CompilerParams(
            dimension_semantics=("parallel", "arbitrary"),
            vmem_limit_bytes=_vmem_limit(est)),
        cost_estimate=pl.CostEstimate(
            flops=flops, transcendentals=0, bytes_accessed=bytes_accessed),
    )(x_flat, w1_taps, shift, w2_p, b2_p)

    out = out.reshape(N, H_pad, Wb, Cpad)[:, :H, :W, :Ccls].astype(jnp.float32)
    return jnp.transpose(out, (0, 3, 1, 2))


@functools.partial(jax.jit, static_argnames=("th",))
def dec_deeplabv3_head_forward(x_nchw, params, *, th=None):
    """Decoder-head forward. x_nchw: (N, Cin, H, W) f32 -> (N, num_classes, H, W) f32."""
    Cin = x_nchw.shape[1]
    if 9 * Cin <= 128:
        return _forward_small_cin(x_nchw, params)
    return _forward_large_cin(x_nchw, params, th=th)


# ---------------------------------------------------------------------------
# Pure-JAX f32 reference and parameter construction.
# ---------------------------------------------------------------------------
def _reference_forward(x_nchw, params):
    eps = 1e-5
    y = lax.conv_general_dilated(
        x_nchw, params["w1"], (1, 1), ((1, 1), (1, 1)),
        dimension_numbers=("NCHW", "OIHW", "NCHW"))
    scale = params["gamma"] / jnp.sqrt(params["running_var"] + eps)
    y = (y - params["running_mean"][None, :, None, None]) * scale[None, :, None, None] \
        + params["beta"][None, :, None, None]
    y = jnp.maximum(y, 0.0)
    y = lax.conv_general_dilated(
        y, params["w2"], (1, 1), ((0, 0), (0, 0)),
        dimension_numbers=("NCHW", "OIHW", "NCHW"))
    return y + params["b2"][None, :, None, None]


def make_params(key, in_planes, num_classes=19, mid=256, w_scale=0.05):
    ks = jax.random.split(key, 7)
    return {
        "w1": jax.random.normal(ks[0], (mid, in_planes, 3, 3), jnp.float32) * w_scale,
        "gamma": 1.0 + 0.1 * jax.random.normal(ks[1], (mid,), jnp.float32),
        "beta": 0.1 * jax.random.normal(ks[2], (mid,), jnp.float32),
        "running_mean": 0.1 * jax.random.normal(ks[3], (mid,), jnp.float32),
        "running_var": jnp.abs(1.0 + 0.1 * jax.random.normal(ks[4], (mid,), jnp.float32)),
        "w2": jax.random.normal(ks[5], (num_classes, mid, 1, 1), jnp.float32) * w_scale,
        "b2": jax.random.normal(ks[6], (num_classes,), jnp.float32) * w_scale,
    }


if __name__ == "__main__":
    key = jax.random.PRNGKey(0)
    kx1, kp1, kx2, kp2 = jax.random.split(key, 4)
    num_classes = 19

    # 1) Small-Cin path (the requested small test shape).
    N, Cin, H, W = 2, 4, 16, 16
    x = jax.random.normal(kx1, (N, Cin, H, W), jnp.float32)
    params = make_params(kp1, Cin, num_classes)
    out = jax.block_until_ready(dec_deeplabv3_head_forward(x, params))
    ref = jax.block_until_ready(_reference_forward(x, params))
    assert out.shape == (N, num_classes, H, W), out.shape
    err = float(jnp.max(jnp.abs(out - ref)))
    # bf16 activations/weights with f32 accumulation -> loosened tolerance.
    assert jnp.allclose(out, ref, rtol=2e-2, atol=2e-2), err

    # 2) Large-Cin halo path (ASPP-sized channels; exercises the DMA pipeline).
    N2, Cin2, H2, W2 = 2, 256, 24, 24
    x2 = jax.random.normal(kx2, (N2, Cin2, H2, W2), jnp.float32)
    params2 = make_params(kp2, Cin2, num_classes, w_scale=0.02)
    out2 = jax.block_until_ready(dec_deeplabv3_head_forward(x2, params2))
    ref2 = jax.block_until_ready(_reference_forward(x2, params2))
    assert out2.shape == (N2, num_classes, H2, W2), out2.shape
    err2 = float(jnp.max(jnp.abs(out2 - ref2)))
    # K = 9*256 bf16 accumulations plus a bf16 logit store -> slightly looser.
    assert jnp.allclose(out2, ref2, rtol=3e-2, atol=3e-2), err2

    print("KERNEL_OK")
</pallas_src>

<mosaic_0001>
module attributes {stable_mosaic.version = 11 : i64} {
  func.func @_matmul_head_kernel(%arg0: i32, %arg1: memref<512x40xbf16, #tpu.memory_space<vmem>>, %arg2: memref<40x256xbf16, #tpu.memory_space<vmem>>, %arg3: memref<1x256xf32, #tpu.memory_space<vmem>>, %arg4: memref<256x128xbf16, #tpu.memory_space<vmem>>, %arg5: memref<1x128xf32, #tpu.memory_space<vmem>>, %arg6: memref<512x128xbf16, #tpu.memory_space<vmem>>) attributes {dimension_semantics = [#tpu.dimension_semantics<parallel>], iteration_bounds = array<i64: 1>, scalar_prefetch = 0 : i64, scratch_operands = 0 : i64, tpu.core_type = #tpu.core_type<tc>, window_params = [{transform_indices = @transform_0, window_bounds = array<i64: 512, 40>}, {pipeline_mode = #tpu.pipeline_mode<synchronous>, transform_indices = @transform_1, window_bounds = array<i64: 40, 256>}, {pipeline_mode = #tpu.pipeline_mode<synchronous>, transform_indices = @transform_2, window_bounds = array<i64: 1, 256>}, {pipeline_mode = #tpu.pipeline_mode<synchronous>, transform_indices = @transform_3, window_bounds = array<i64: 256, 128>}, {pipeline_mode = #tpu.pipeline_mode<synchronous>, transform_indices = @transform_4, window_bounds = array<i64: 1, 128>}, {transform_indices = @transform_5, window_bounds = array<i64: 512, 128>}]} {
    %c0 = arith.constant 0 : index
    %c0_0 = arith.constant 0 : index
    %0 = vector.load %arg1[%c0, %c0_0] : memref<512x40xbf16, #tpu.memory_space<vmem>>, vector<512x40xbf16>
    %c0_1 = arith.constant 0 : index
    %c0_2 = arith.constant 0 : index
    %1 = vector.load %arg2[%c0_1, %c0_2] : memref<40x256xbf16, #tpu.memory_space<vmem>>, vector<40x256xbf16>
    %cst = arith.constant dense<0.000000e+00> : vector<512x256xf32>
    %2 = tpu.matmul %0, %1, %cst {dimension_numbers = #tpu.dot_dimension_numbers<[1], [0], [0], [1], [0, 0, 1, 1], [], []>} : vector<512x40xbf16>, vector<40x256xbf16>, vector<512x256xf32> -> vector<512x256xf32>
    %c0_3 = arith.constant 0 : index
    %c0_4 = arith.constant 0 : index
    %3 = vector.load %arg3[%c0_3, %c0_4] : memref<1x256xf32, #tpu.memory_space<vmem>>, vector<1x256xf32>
    %4 = vector.broadcast %3 : vector<1x256xf32> to vector<512x256xf32>
    %5 = arith.addf %2, %4 : vector<512x256xf32>
    %cst_5 = arith.constant 0.000000e+00 : f32
    %6 = vector.broadcast %cst_5 : f32 to vector<512x256xf32>
    %7 = arith.maximumf %5, %6 : vector<512x256xf32>
    %8 = arith.truncf %7 : vector<512x256xf32> to vector<512x256xbf16>
    %c0_6 = arith.constant 0 : index
    %c0_7 = arith.constant 0 : index
    %9 = vector.load %arg4[%c0_6, %c0_7] : memref<256x128xbf16, #tpu.memory_space<vmem>>, vector<256x128xbf16>
    %cst_8 = arith.constant dense<0.000000e+00> : vector<512x128xf32>
    %10 = tpu.matmul %8, %9, %cst_8 {dimension_numbers = #tpu.dot_dimension_numbers<[1], [0], [0], [1], [0, 0, 1, 1], [], []>} : vector<512x256xbf16>, vector<256x128xbf16>, vector<512x128xf32> -> vector<512x128xf32>
    %c0_9 = arith.constant 0 : index
    %c0_10 = arith.constant 0 : index
    %11 = vector.load %arg5[%c0_9, %c0_10] : memref<1x128xf32, #tpu.memory_space<vmem>>, vector<1x128xf32>
    %12 = vector.broadcast %11 : vector<1x128xf32> to vector<512x128xf32>
    %13 = arith.addf %10, %12 : vector<512x128xf32>
    %14 = arith.truncf %13 : vector<512x128xf32> to vector<512x128xbf16>
    %c0_11 = arith.constant 0 : index
    %c0_12 = arith.constant 0 : index
    %15 = vector.load %arg6[%c0_11, %c0_12] : memref<512x128xbf16, #tpu.memory_space<vmem>>, vector<512x128xbf16>
    tpu.vector_store %arg6[%c0_11, %c0_12], %14 {strides = array<i32>} : memref<512x128xbf16, #tpu.memory_space<vmem>>, vector<512x128xbf16>,
    return
  }
  func.func @transform_0(%arg0: i32) -> (i32, i32) {
    %c0_i32 = arith.constant 0 : i32
    %c0_i32_0 = arith.constant 0 : i32
    return %arg0, %c0_i32 : i32, i32
  }
  func.func @transform_1(%arg0: i32) -> (i32, i32) {
    %c0_i32 = arith.constant 0 : i32
    %c0_i32_0 = arith.constant 0 : i32
    %c0_i32_1 = arith.constant 0 : i32
    return %c0_i32, %c0_i32_0 : i32, i32
  }
  func.func @transform_2(%arg0: i32) -> (i32, i32) {
    %c0_i32 = arith.constant 0 : i32
    %c0_i32_0 = arith.constant 0 : i32
    %c0_i32_1 = arith.constant 0 : i32
    return %c0_i32, %c0_i32_0 : i32, i32
  }
  func.func @transform_3(%arg0: i32) -> (i32, i32) {
    %c0_i32 = arith.constant 0 : i32
    %c0_i32_0 = arith.constant 0 : i32
    %c0_i32_1 = arith.constant 0 : i32
    return %c0_i32, %c0_i32_0 : i32, i32
  }
  func.func @transform_4(%arg0: i32) -> (i32, i32) {
    %c0_i32 = arith.constant 0 : i32
    %c0_i32_0 = arith.constant 0 : i32
    %c0_i32_1 = arith.constant 0 : i32
    return %c0_i32, %c0_i32_0 : i32, i32
  }
  func.func @transform_5(%arg0: i32) -> (i32, i32) {
    %c0_i32 = arith.constant 0 : i32
    %c0_i32_0 = arith.constant 0 : i32
    return %arg0, %c0_i32 : i32, i32
  }
}

</mosaic_0001>

<bundles_post_ra>
// kernel: dec_deeplabv3_head_forward.1
= control target key start
LH: loop header
LB: loop body
LE: loop exit
PB: predicated region body
PF: predicated region fallthrough
CT: control target
= control target key end

     0   :  { %vm378_vm0 = vcmask 1043456   ;;  %vm281_vm1 = vcmask 326656   ;;  %s2604_s1 = inlined_call_operand.vmem [shape: bf16[40,256], index: 1, kind: input, shape index: {}]   ;;  %s2605_s0 = inlined_call_operand.vmem [shape: bf16[512,40], index: 0, kind: input, shape index: {}]   ;;  %s2606_s3 = inlined_call_operand.vmem [shape: bf16[256,128], index: 3, kind: input, shape index: {}]   ;;  %s2607_s2 = inlined_call_operand.vmem [shape: f32[1,256], index: 2, kind: input, shape index: {}]   ;;  %s2608_s4 = inlined_call_operand.vmem [shape: f32[1,128], index: 4, kind: input, shape index: {}]   ;;  %s2609_s5 = inlined_call_operand.vmem [shape: bf16[512,128], index: 5, kind: output, shape index: {}]  }
   0x1   :  { %v89_v0 = vld [vmem:[%s2604_s1 + $0x20] sm:$0xff]  ;;  %v1655_v3 = vld [vmem:[%s2604_s1 + $0x10] sm:$0xf]  ;;  %v1824_v6 = vld [vmem:[%s2604_s1 + $0x14] sm:$0xf0] }
   0x2   :  { %v269_v1 = vunpack.c.l.b16 %v89_v0  ;;  %v270_v2 = vunpack.c.h.b16 %v89_v0  ;;  %v1823_v7 = vld [vmem:[%s2604_s1 + $0x14] sm:$0xf]  ;;  %v1657_v8 = vld [vmem:[%s2604_s1 + $0x18] sm:$0xf0]  ;;  %v1656_v11 = vor.u32 %v1824_v6, %v1655_v3  ;;  %v1647_v13 = vld [vmem:[%s2604_s1] sm:$0xf] }
   0x3   :  { %v1660_v12 = vor.u32 %v1823_v7, %v1657_v8  ;;  %v1822_v14 = vld [vmem:[%s2604_s1 + $0x4] sm:$0xf0]  ;;  %v1821_v15 = vld [vmem:[%s2604_s1 + $0x4] sm:$0xf]  ;;  %v1649_v16 = vld [vmem:[%s2604_s1 + $0x8] sm:$0xf0] }
   0x4   :  { %v275_v4 = vpack.c.b16 %v269_v1, %v269_v1  ;;  %v276_v5 = vpack.c.b16 %v270_v2, %v270_v2  ;;  %v1648_v17 = vor.u32 %v1822_v14, %v1647_v13  ;;  %v1652_v18 = vor.u32 %v1821_v15, %v1649_v16  ;;  %v1789_v19 = vld [vmem:[%s2605_s0] sm:$0xff]  ;;  %v1790_v20 = vld [vmem:[%s2605_s0 + $0x8] sm:$0xff]  ;;  %v1791_v21 = vld [vmem:[%s2605_s0 + $0x10] sm:$0xff] }
   0x5   :  { %v1792_v22 = vld [vmem:[%s2605_s0 + $0x18] sm:$0xff]  ;;  %v1793_v23 = vld [vmem:[%s2605_s0 + $0x20] sm:$0xff]  ;;  %v1794_v26 = vld [vmem:[%s2605_s0 + $0x28] sm:$0xff] }
   0x6   :  { %v380_v9 = vsel %vm378_vm0, %v275_v4, 0  ;;  %v383_v10 = vsel %vm378_vm0, %v276_v5, 0  ;;  %v1832_v24 = vld [vmem:[%s2606_s3 + $0x38] sm:$0xff]  ;;  %v1831_v27 = vld [vmem:[%s2606_s3 + $0x30] sm:$0xff]  ;;  %v1830_v29 = vld [vmem:[%s2606_s3 + $0x28] sm:$0xff] }
   0x7   :  { %390 = vmatpush.bf16.msra.mxu0 %v380_v9  ;;  %559 = vmatpush.bf16.msra.mxu1 %v383_v10  ;;  %v1840_v25 = vld [vmem:[%s2606_s3 + $0x78] sm:$0xff]  ;;  %v1839_v28 = vld [vmem:[%s2606_s3 + $0x70] sm:$0xff]  ;;  %v1838_v30 = vld [vmem:[%s2606_s3 + $0x68] sm:$0xff] }
   0x8   :  { %1047 = vmatpush.bf16.msra.mxu2 %v1832_v24  ;;  %1216 = vmatpush.bf16.msra.mxu3 %v1840_v25  ;;  %v1829_v31 = vld [vmem:[%s2606_s3 + $0x20] sm:$0xff]  ;;  %v1828_v33 = vld [vmem:[%s2606_s3 + $0x18] sm:$0xff]  ;;  %v1795_v35 = vld [vmem:[%s2605_s0 + $0x30] sm:$0xff] }
   0x9   :  { %v1837_v32 = vld [vmem:[%s2606_s3 + $0x60] sm:$0xff]  ;;  %v1836_v34 = vld [vmem:[%s2606_s3 + $0x58] sm:$0xff]  ;;  %v1827_v36 = vld [vmem:[%s2606_s3 + $0x10] sm:$0xff] }
   0xa   :  { %v1835_v37 = vld [vmem:[%s2606_s3 + $0x50] sm:$0xff]  ;;  %v1826_v38 = vld [vmem:[%s2606_s3 + $0x8] sm:$0xff]  ;;  %v1825_v40 = vld [vmem:[%s2606_s3] sm:$0xff] }
   0xb   :  { %391 = vmatpush.bf16.msra.mxu0 %v1656_v11  ;;  %560 = vmatpush.bf16.msra.mxu1 %v1660_v12  ;;  %v1834_v39 = vld [vmem:[%s2606_s3 + $0x48] sm:$0xff]  ;;  %v1833_v41 = vld [vmem:[%s2606_s3 + $0x40] sm:$0xff]  ;;  %v1796_v42 = vld [vmem:[%s2605_s0 + $0x38] sm:$0xff] }
   0xc   :  { %1048 = vmatpush.bf16.msra.mxu2 %v1831_v27  ;;  %1217 = vmatpush.bf16.msra.mxu3 %v1839_v28  ;;  %v1797_v43 = vld [vmem:[%s2605_s0 + $0x40] sm:$0xff]  ;;  %v1798_v61 = vld [vmem:[%s2605_s0 + $0x48] sm:$0xff]  ;;  %v1799_v12 = vld [vmem:[%s2605_s0 + $0x50] sm:$0xff] }
   0xd   :  { %v90_v44 = vld [vmem:[%s2607_s2] sm:$0x3]  ;;  %v1800_v27 = vld [vmem:[%s2605_s0 + $0x58] sm:$0xff] }
   0xe   :  { %v2185_v47 = vperm.slane %v90_v44, 0  ;;  %v2187_v48 = vperm.slane %v90_v44, 1 }
   0xf   :  { %392 = vmatpush.bf16.msra.mxu0 %v1648_v17  ;;  %561 = vmatpush.bf16.msra.mxu1 %v1652_v18 }
  0x10   :  { %1049 = vmatpush.bf16.msra.mxu2 %v1830_v29  ;;  %1218 = vmatpush.bf16.msra.mxu3 %v1838_v30 }
  0x12   :  { %1661 = vmatmul.msk.bf16.vlgmr.msra.gmra.mxu0 %vm281_vm1, %v1789_v19  ;;  %1693 = vmatmul.msk.bf16.vlgmr.msra.gmra.mxu1 %vm281_vm1, %v1789_v19 }
  0x14   :  { %1050 = vmatpush.bf16.msra.mxu2 %v1829_v31  ;;  %1219 = vmatpush.bf16.msra.mxu3 %v1837_v32 }
  0x18   :  { %1051 = vmatpush.bf16.msra.mxu2 %v1828_v33  ;;  %1220 = vmatpush.bf16.msra.mxu3 %v1836_v34 }
  0x1c   :  { %1052 = vmatpush.bf16.msra.mxu2 %v1827_v36  ;;  %1221 = vmatpush.bf16.msra.mxu3 %v1835_v37 }
  0x20   :  { %1053 = vmatpush.bf16.msra.mxu2 %v1826_v38  ;;  %1222 = vmatpush.bf16.msra.mxu3 %v1834_v39 }
  0x22   :  { %1662 = vmatmul.msk.bf16.gmra.mxu0 %vm281_vm1, %v1790_v20  ;;  %1694 = vmatmul.msk.bf16.gmra.mxu1 %vm281_vm1, %v1790_v20 }
  0x24   :  { %1054 = vmatpush.bf16.msra.mxu2 %v1825_v40  ;;  %1223 = vmatpush.bf16.msra.mxu3 %v1833_v41 }
  0x32   :  { %1663 = vmatmul.msk.bf16.gmra.mxu0 %vm281_vm1, %v1791_v21  ;;  %1695 = vmatmul.msk.bf16.gmra.mxu1 %vm281_vm1, %v1791_v21 }
  0x42   :  { %1664 = vmatmul.msk.bf16.gmra.mxu0 %vm281_vm1, %v1792_v22  ;;  %1696 = vmatmul.msk.bf16.gmra.mxu1 %vm281_vm1, %v1792_v22 }
  0x52   :  { %1665 = vmatmul.msk.bf16.gmra.mxu0 %vm281_vm1, %v1793_v23  ;;  %1697 = vmatmul.msk.bf16.gmra.mxu1 %vm281_vm1, %v1793_v23 }
  0x62   :  { %1666 = vmatmul.msk.bf16.gmra.mxu0 %vm281_vm1, %v1794_v26  ;;  %1698 = vmatmul.msk.bf16.gmra.mxu1 %vm281_vm1, %v1794_v26 }
  0x72   :  { %1667 = vmatmul.msk.bf16.gmra.mxu0 %vm281_vm1, %v1795_v35  ;;  %1699 = vmatmul.msk.bf16.gmra.mxu1 %vm281_vm1, %v1795_v35 }
  0x82   :  { %1668 = vmatmul.msk.bf16.gmra.mxu0 %vm281_vm1, %v1796_v42  ;;  %1700 = vmatmul.msk.bf16.gmra.mxu1 %vm281_vm1, %v1796_v42  ;;  %v1801_v42 = vld [vmem:[%s2605_s0 + $0x60] sm:$0xff] }
  0x8f   :  { %v394_v45 = vpop.f32.mrf.mxu0  ;;  %v563_v46 = vpop.f32.mrf.mxu1 }
  0x90   :  { %v395_v49 = vadd.f32 %v394_v45, %v2185_v47  ;;  %v564_v50 = vadd.f32 %v563_v46, %v2187_v48 }
  0x92   :  { %1669 = vmatmul.msk.bf16.gmra.mxu0 %vm281_vm1, %v1797_v43  ;;  %1701 = vmatmul.msk.bf16.gmra.mxu1 %vm281_vm1, %v1797_v43  ;;  %v723_v55 = vmax.f32 %v395_v49, 0.0  ;;  %v724_v56 = vmax.f32 %v564_v50, 0.0 }
  0x97   :  { %v396_v51 = vpop.f32.mrf.mxu0  ;;  %v565_v52 = vpop.f32.mrf.mxu1 }
  0x98   :  { %v397_v53 = vadd.f32 %v396_v51, %v2185_v47  ;;  %v566_v54 = vadd.f32 %v565_v52, %v2187_v48 }
  0x9a   :  { %v725_v57 = vmax.f32 %v397_v53, 0.0  ;;  %v726_v58 = vmax.f32 %v566_v54, 0.0 }
  0x9c   :  { %v851_v59 = vpack.c.bf16 %v725_v57, %v723_v55  ;;  %v852_v60 = vpack.c.bf16 %v726_v58, %v724_v56 }
  0x9e   :  { %1055 = vmatmul.bf16.vlgmr.msra.gmra.mxu2 %v851_v59  ;;  %1224 = vmatmul.bf16.vlgmr.msra.gmra.mxu3 %v852_v60  ;;  %v1802_v59 = vld [vmem:[%s2605_s0 + $0x68] sm:$0xff] }
  0x9f   :  { %v399_v62 = vpop.f32.mrf.mxu0  ;;  %v568_v63 = vpop.f32.mrf.mxu1 }
  0xa0   :  { %v400_v0 = vadd.f32 %v399_v62, %v2185_v47  ;;  %v569_v1 = vadd.f32 %v568_v63, %v2187_v48 }
  0xa2   :  { %1670 = vmatmul.msk.bf16.gmra.mxu0 %vm281_vm1, %v1798_v61  ;;  %1702 = vmatmul.msk.bf16.gmra.mxu1 %vm281_vm1, %v1798_v61  ;;  %v727_v6 = vmax.f32 %v400_v0, 0.0  ;;  %v728_v7 = vmax.f32 %v569_v1, 0.0 }
  0xa7   :  { %v401_v2 = vpop.f32.mrf.mxu0  ;;  %v570_v3 = vpop.f32.mrf.mxu1 }
  0xa8   :  { %v402_v4 = vadd.f32 %v401_v2, %v2185_v47  ;;  %v571_v5 = vadd.f32 %v570_v3, %v2187_v48 }
  0xaa   :  { %v729_v8 = vmax.f32 %v402_v4, 0.0  ;;  %v730_v9 = vmax.f32 %v571_v5, 0.0 }
  0xac   :  { %v853_v10 = vpack.c.bf16 %v729_v8, %v727_v6  ;;  %v854_v11 = vpack.c.bf16 %v730_v9, %v728_v7 }
  0xae   :  { %1060 = vmatmul.bf16.gmra.mxu2 %v853_v10  ;;  %1229 = vmatmul.bf16.gmra.mxu3 %v854_v11  ;;  %v1803_v10 = vld [vmem:[%s2605_s0 + $0x70] sm:$0xff] }
  0xaf   :  { %v404_v13 = vpop.f32.mrf.mxu0  ;;  %v573_v14 = vpop.f32.mrf.mxu1 }
  0xb0   :  { %v405_v15 = vadd.f32 %v404_v13, %v2185_v47  ;;  %v574_v16 = vadd.f32 %v573_v14, %v2187_v48 }
  0xb2   :  { %1671 = vmatmul.msk.bf16.gmra.mxu0 %vm281_vm1, %v1799_v12  ;;  %1703 = vmatmul.msk.bf16.gmra.mxu1 %vm281_vm1, %v1799_v12  ;;  %v731_v21 = vmax.f32 %v405_v15, 0.0  ;;  %v732_v22 = vmax.f32 %v574_v16, 0.0 }
  0xb7   :  { %v406_v17 = vpop.f32.mrf.mxu0  ;;  %v575_v18 = vpop.f32.mrf.mxu1 }
  0xb8   :  { %v407_v19 = vadd.f32 %v406_v17, %v2185_v47  ;;  %v576_v20 = vadd.f32 %v575_v18, %v2187_v48 }
  0xba   :  { %v733_v23 = vmax.f32 %v407_v19, 0.0  ;;  %v734_v24 = vmax.f32 %v576_v20, 0.0 }
  0xbc   :  { %v855_v25 = vpack.c.bf16 %v733_v23, %v731_v21  ;;  %v856_v26 = vpack.c.bf16 %v734_v24, %v732_v22 }
  0xbe   :  { %1065 = vmatmul.bf16.gmra.mxu2 %v855_v25  ;;  %1234 = vmatmul.bf16.gmra.mxu3 %v856_v26  ;;  %v1804_v25 = vld [vmem:[%s2605_s0 + $0x78] sm:$0xff] }
  0xbf   :  { %v409_v28 = vpop.f32.mrf.mxu0  ;;  %v578_v29 = vpop.f32.mrf.mxu1 }
  0xc0   :  { %v410_v30 = vadd.f32 %v409_v28, %v2185_v47  ;;  %v579_v31 = vadd.f32 %v578_v29, %v2187_v48 }
  0xc2   :  { %1672 = vmatmul.msk.bf16.gmra.mxu0 %vm281_vm1, %v1800_v27  ;;  %1704 = vmatmul.msk.bf16.gmra.mxu1 %vm281_vm1, %v1800_v27  ;;  %v735_v36 = vmax.f32 %v410_v30, 0.0  ;;  %v736_v37 = vmax.f32 %v579_v31, 0.0 }
  0xc7   :  { %v411_v32 = vpop.f32.mrf.mxu0  ;;  %v580_v33 = vpop.f32.mrf.mxu1 }
  0xc8   :  { %v412_v34 = vadd.f32 %v411_v32, %v2185_v47  ;;  %v581_v35 = vadd.f32 %v580_v33, %v2187_v48 }
  0xca   :  { %v737_v38 = vmax.f32 %v412_v34, 0.0  ;;  %v738_v39 = vmax.f32 %v581_v35, 0.0 }
  0xcc   :  { %v857_v40 = vpack.c.bf16 %v737_v38, %v735_v36  ;;  %v858_v41 = vpack.c.bf16 %v738_v39, %v736_v37 }
  0xce   :  { %1070 = vmatmul.bf16.gmra.mxu2 %v857_v40  ;;  %1239 = vmatmul.bf16.gmra.mxu3 %v858_v41  ;;  %v1805_v40 = vld [vmem:[%s2605_s0 + $0x80] sm:$0xff] }
  0xcf   :  { %v414_v43 = vpop.f32.mrf.mxu0  ;;  %v583_v44 = vpop.f32.mrf.mxu1 }
  0xd0   :  { %v415_v45 = vadd.f32 %v414_v43, %v2185_v47  ;;  %v584_v46 = vadd.f32 %v583_v44, %v2187_v48 }
  0xd2   :  { %1673 = vmatmul.msk.bf16.gmra.mxu0 %vm281_vm1, %v1801_v42  ;;  %1705 = vmatmul.msk.bf16.gmra.mxu1 %vm281_vm1, %v1801_v42  ;;  %v739_v53 = vmax.f32 %v415_v45, 0.0  ;;  %v740_v54 = vmax.f32 %v584_v46, 0.0 }
  0xd7   :  { %v416_v49 = vpop.f32.mrf.mxu0  ;;  %v585_v50 = vpop.f32.mrf.mxu1 }
  0xd8   :  { %v417_v51 = vadd.f32 %v416_v49, %v2185_v47  ;;  %v586_v52 = vadd.f32 %v585_v50, %v2187_v48 }
  0xda   :  { %v741_v55 = vmax.f32 %v417_v51, 0.0  ;;  %v742_v56 = vmax.f32 %v586_v52, 0.0 }
  0xdc   :  { %v859_v57 = vpack.c.bf16 %v741_v55, %v739_v53  ;;  %v860_v58 = vpack.c.bf16 %v742_v56, %v740_v54 }
  0xde   :  { %1075 = vmatmul.bf16.gmra.mxu2 %v859_v57  ;;  %1244 = vmatmul.bf16.gmra.mxu3 %v860_v58  ;;  %v1806_v57 = vld [vmem:[%s2605_s0 + $0x88] sm:$0xff] }
  0xdf   :  { %v419_v60 = vpop.f32.mrf.mxu0  ;;  %v588_v61 = vpop.f32.mrf.mxu1 }
  0xe0   :  { %v420_v62 = vadd.f32 %v419_v60, %v2185_v47  ;;  %v589_v63 = vadd.f32 %v588_v61, %v2187_v48 }
  0xe2   :  { %1674 = vmatmul.msk.bf16.gmra.mxu0 %vm281_vm1, %v1802_v59  ;;  %1706 = vmatmul.msk.bf16.gmra.mxu1 %vm281_vm1, %v1802_v59  ;;  %v743_v4 = vmax.f32 %v420_v62, 0.0  ;;  %v744_v5 = vmax.f32 %v589_v63, 0.0  ;;  %v2275_v62 = vld [vmem:[%s2608_s4] ss:$0 sm:$0xff] }
  0xe7   :  { %v421_v0 = vpop.f32.mrf.mxu0  ;;  %v590_v1 = vpop.f32.mrf.mxu1 }
  0xe8   :  { %v422_v2 = vadd.f32 %v421_v0, %v2185_v47  ;;  %v591_v3 = vadd.f32 %v590_v1, %v2187_v48 }
  0xea   :  { %v745_v6 = vmax.f32 %v422_v2, 0.0  ;;  %v746_v7 = vmax.f32 %v591_v3, 0.0 }
  0xec   :  { %v861_v8 = vpack.c.bf16 %v745_v6, %v743_v4  ;;  %v862_v9 = vpack.c.bf16 %v746_v7, %v744_v5 }
  0xee   :  { %1080 = vmatmul.bf16.gmra.mxu2 %v861_v8  ;;  %1249 = vmatmul.bf16.gmra.mxu3 %v862_v9 }
  0xef   :  { %v424_v11 = vpop.f32.mrf.mxu0  ;;  %v593_v12 = vpop.f32.mrf.mxu1 }
  0xf0   :  { %v425_v13 = vadd.f32 %v424_v11, %v2185_v47  ;;  %v594_v14 = vadd.f32 %v593_v12, %v2187_v48 }
  0xf2   :  { %1675 = vmatmul.msk.bf16.gmra.mxu0 %vm281_vm1, %v1803_v10  ;;  %1707 = vmatmul.msk.bf16.gmra.mxu1 %vm281_vm1, %v1803_v10  ;;  %v747_v19 = vmax.f32 %v425_v13, 0.0  ;;  %v748_v20 = vmax.f32 %v594_v14, 0.0 }
  0xf7   :  { %v426_v15 = vpop.f32.mrf.mxu0  ;;  %v595_v16 = vpop.f32.mrf.mxu1 }
  0xf8   :  { %v427_v17 = vadd.f32 %v426_v15, %v2185_v47  ;;  %v596_v18 = vadd.f32 %v595_v16, %v2187_v48 }
  0xfa   :  { %v749_v21 = vmax.f32 %v427_v17, 0.0  ;;  %v750_v22 = vmax.f32 %v596_v18, 0.0  ;;  %v1807_v18 = vld [vmem:[%s2605_s0 + $0x90] sm:$0xff] }
  0xfc   :  { %v863_v23 = vpack.c.bf16 %v749_v21, %v747_v19  ;;  %v864_v24 = vpack.c.bf16 %v750_v22, %v748_v20 }
  0xfe   :  { %1085 = vmatmul.bf16.gmra.mxu2 %v863_v23  ;;  %1254 = vmatmul.bf16.gmra.mxu3 %v864_v24 }
  0xff   :  { %v429_v26 = vpop.f32.mrf.mxu0  ;;  %v598_v27 = vpop.f32.mrf.mxu1 }
 0x100   :  { %v430_v28 = vadd.f32 %v429_v26, %v2185_v47  ;;  %v599_v29 = vadd.f32 %v598_v27, %v2187_v48 }
 0x102   :  { %1676 = vmatmul.msk.bf16.gmra.mxu0 %vm281_vm1, %v1804_v25  ;;  %1708 = vmatmul.msk.bf16.gmra.mxu1 %vm281_vm1, %v1804_v25  ;;  %v751_v34 = vmax.f32 %v430_v28, 0.0  ;;  %v752_v35 = vmax.f32 %v599_v29, 0.0 }
 0x107   :  { %v431_v30 = vpop.f32.mrf.mxu0  ;;  %v600_v31 = vpop.f32.mrf.mxu1 }
 0x108   :  { %v432_v32 = vadd.f32 %v431_v30, %v2185_v47  ;;  %v601_v33 = vadd.f32 %v600_v31, %v2187_v48 }
 0x10a   :  { %v753_v36 = vmax.f32 %v432_v32, 0.0  ;;  %v754_v37 = vmax.f32 %v601_v33, 0.0 }
 0x10c   :  { %v865_v38 = vpack.c.bf16 %v753_v36, %v751_v34  ;;  %v866_v39 = vpack.c.bf16 %v754_v37, %v752_v35 }
 0x10e   :  { %1090 = vmatmul.bf16.gmra.mxu2 %v865_v38  ;;  %1259 = vmatmul.bf16.gmra.mxu3 %v866_v39 }
 0x10f   :  { %v434_v41 = vpop.f32.mrf.mxu0  ;;  %v603_v42 = vpop.f32.mrf.mxu1 }
 0x110   :  { %v435_v43 = vadd.f32 %v434_v41, %v2185_v47  ;;  %v604_v44 = vadd.f32 %v603_v42, %v2187_v48  ;;  %v1808_v42 = vld [vmem:[%s2605_s0 + $0x98] sm:$0xff] }
 0x112   :  { %1677 = vmatmul.msk.bf16.gmra.mxu0 %vm281_vm1, %v1805_v40  ;;  %1709 = vmatmul.msk.bf16.gmra.mxu1 %vm281_vm1, %v1805_v40  ;;  %v755_v51 = vmax.f32 %v435_v43, 0.0  ;;  %v756_v52 = vmax.f32 %v604_v44, 0.0 }
 0x117   :  { %v436_v45 = vpop.f32.mrf.mxu0  ;;  %v605_v46 = vpop.f32.mrf.mxu1 }
 0x118   :  { %v437_v49 = vadd.f32 %v436_v45, %v2185_v47  ;;  %v606_v50 = vadd.f32 %v605_v46, %v2187_v48 }
 0x11a   :  { %v757_v53 = vmax.f32 %v437_v49, 0.0  ;;  %v758_v54 = vmax.f32 %v606_v50, 0.0 }
 0x11c   :  { %v867_v55 = vpack.c.bf16 %v757_v53, %v755_v51  ;;  %v868_v56 = vpack.c.bf16 %v758_v54, %v756_v52 }
 0x11e   :  { %1095 = vmatmul.bf16.gmra.mxu2 %v867_v55  ;;  %1264 = vmatmul.bf16.gmra.mxu3 %v868_v56 }
 0x11f   :  { %v439_v58 = vpop.f32.mrf.mxu0  ;;  %v608_v59 = vpop.f32.mrf.mxu1 }
 0x120   :  { %v440_v63 = vadd.f32 %v439_v58, %v2185_v47  ;;  %v609_v0 = vadd.f32 %v608_v59, %v2187_v48 }
 0x121   :  { %v1056_v60 = vpop.f32.mrf.mxu2  ;;  %v1225_v61 = vpop.f32.mrf.mxu3 }
 0x122   :  { %1678 = vmatmul.msk.bf16.gmra.mxu0 %vm281_vm1, %v1806_v57  ;;  %1710 = vmatmul.msk.bf16.gmra.mxu1 %vm281_vm1, %v1806_v57  ;;  %v1057_v3 = vadd.f32 %v2275_v62, %v1056_v60  ;;  %v759_v6 = vmax.f32 %v440_v63, 0.0  ;;  %v760_v9 = vmax.f32 %v609_v0, 0.0 }
 0x124   :  { %v1226_v13 = vadd.f32 %v1225_v61, %v1057_v3 }
 0x127   :  { %v441_v1 = vpop.f32.mrf.mxu0  ;;  %v610_v2 = vpop.f32.mrf.mxu1 }
 0x128   :  { %v442_v4 = vadd.f32 %v441_v1, %v2185_v47  ;;  %v611_v5 = vadd.f32 %v610_v2, %v2187_v48 }
 0x129   :  { %v1058_v7 = vpop.f32.mrf.mxu2  ;;  %v1227_v8 = vpop.f32.mrf.mxu3 }
 0x12a   :  { %v761_v10 = vmax.f32 %v442_v4, 0.0  ;;  %v762_v11 = vmax.f32 %v611_v5, 0.0  ;;  %v1059_v12 = vadd.f32 %v2275_v62, %v1058_v7  ;;  %v1809_v5 = vld [vmem:[%s2605_s0 + $0xa0] sm:$0xff] }
 0x12c   :  { %v1228_v14 = vadd.f32 %v1227_v8, %v1059_v12  ;;  %v869_v15 = vpack.c.bf16 %v761_v10, %v759_v6  ;;  %v870_v16 = vpack.c.bf16 %v762_v11, %v760_v9 }
 0x12e   :  { %v1844_v17 = vpack.c.bf16 %v1228_v14, %v1226_v13  ;;  %1100 = vmatmul.bf16.gmra.mxu2 %v869_v15  ;;  %1269 = vmatmul.bf16.gmra.mxu3 %v870_v16 }
 0x12f   :  { %v444_v19 = vpop.f32.mrf.mxu0  ;;  %v613_v20 = vpop.f32.mrf.mxu1 }
 0x130   :  { %1845 = vst [vmem:[%s2609_s5] sm:$0xff] %v1844_v17   ;;  %v445_v23 = vadd.f32 %v444_v19, %v2185_v47  ;;  %v614_v24 = vadd.f32 %v613_v20, %v2187_v48 }
 0x131   :  { %v1061_v21 = vpop.f32.mrf.mxu2  ;;  %v1230_v22 = vpop.f32.mrf.mxu3 }
 0x132   :  { %1679 = vmatmul.msk.bf16.gmra.mxu0 %vm281_vm1, %v1807_v18  ;;  %1711 = vmatmul.msk.bf16.gmra.mxu1 %vm281_vm1, %v1807_v18  ;;  %v1062_v27 = vadd.f32 %v2275_v62, %v1061_v21  ;;  %v763_v30 = vmax.f32 %v445_v23, 0.0  ;;  %v764_v33 = vmax.f32 %v614_v24, 0.0 }
 0x134   :  { %v1231_v37 = vadd.f32 %v1230_v22, %v1062_v27 }
 0x137   :  { %v446_v25 = vpop.f32.mrf.mxu0  ;;  %v615_v26 = vpop.f32.mrf.mxu1 }
 0x138   :  { %v447_v28 = vadd.f32 %v446_v25, %v2185_v47  ;;  %v616_v29 = vadd.f32 %v615_v26, %v2187_v48 }
 0x139   :  { %v1063_v31 = vpop.f32.mrf.mxu2  ;;  %v1232_v32 = vpop.f32.mrf.mxu3 }
 0x13a   :  { %v765_v34 = vmax.f32 %v447_v28, 0.0  ;;  %v766_v35 = vmax.f32 %v616_v29, 0.0  ;;  %v1064_v36 = vadd.f32 %v2275_v62, %v1063_v31  ;;  %v1810_v29 = vld [vmem:[%s2605_s0 + $0xa8] sm:$0xff] }
 0x13c   :  { %v1233_v38 = vadd.f32 %v1232_v32, %v1064_v36  ;;  %v871_v39 = vpack.c.bf16 %v765_v34, %v763_v30  ;;  %v872_v40 = vpack.c.bf16 %v766_v35, %v764_v33 }
 0x13e   :  { %v1849_v41 = vpack.c.bf16 %v1233_v38, %v1231_v37  ;;  %1105 = vmatmul.bf16.gmra.mxu2 %v871_v39  ;;  %1274 = vmatmul.bf16.gmra.mxu3 %v872_v40 }
 0x13f   :  { %v449_v43 = vpop.f32.mrf.mxu0  ;;  %v618_v44 = vpop.f32.mrf.mxu1 }
 0x140   :  { %2001 = vst [vmem:[%s2609_s5 + $0x8] sm:$0xff] %v1849_v41   ;;  %v450_v49 = vadd.f32 %v449_v43, %v2185_v47  ;;  %v619_v50 = vadd.f32 %v618_v44, %v2187_v48 }
 0x141   :  { %v1066_v45 = vpop.f32.mrf.mxu2  ;;  %v1235_v46 = vpop.f32.mrf.mxu3 }
 0x142   :  { %1680 = vmatmul.msk.bf16.gmra.mxu0 %vm281_vm1, %v1808_v42  ;;  %1712 = vmatmul.msk.bf16.gmra.mxu1 %vm281_vm1, %v1808_v42  ;;  %v1067_v53 = vadd.f32 %v2275_v62, %v1066_v45  ;;  %v767_v56 = vmax.f32 %v450_v49, 0.0  ;;  %v768_v59 = vmax.f32 %v619_v50, 0.0 }
 0x144   :  { %v1236_v0 = vadd.f32 %v1235_v46, %v1067_v53 }
 0x147   :  { %v451_v51 = vpop.f32.mrf.mxu0  ;;  %v620_v52 = vpop.f32.mrf.mxu1 }
 0x148   :  { %v452_v54 = vadd.f32 %v451_v51, %v2185_v47  ;;  %v621_v55 = vadd.f32 %v620_v52, %v2187_v48 }
 0x149   :  { %v1068_v57 = vpop.f32.mrf.mxu2  ;;  %v1237_v58 = vpop.f32.mrf.mxu3 }
 0x14a   :  { %v769_v60 = vmax.f32 %v452_v54, 0.0  ;;  %v770_v61 = vmax.f32 %v621_v55, 0.0  ;;  %v1069_v63 = vadd.f32 %v2275_v62, %v1068_v57  ;;  %v1811_v55 = vld [vmem:[%s2605_s0 + $0xb0] sm:$0xff] }
 0x14c   :  { %v1238_v1 = vadd.f32 %v1237_v58, %v1069_v63  ;;  %v873_v2 = vpack.c.bf16 %v769_v60, %v767_v56  ;;  %v874_v3 = vpack.c.bf16 %v770_v61, %v768_v59 }
 0x14e   :  { %v1854_v4 = vpack.c.bf16 %v1238_v1, %v1236_v0  ;;  %1110 = vmatmul.bf16.gmra.mxu2 %v873_v2  ;;  %1279 = vmatmul.bf16.gmra.mxu3 %v874_v3 }
 0x14f   :  { %v454_v6 = vpop.f32.mrf.mxu0  ;;  %v623_v7 = vpop.f32.mrf.mxu1 }
 0x150   :  { %2002 = vst [vmem:[%s2609_s5 + $0x10] sm:$0xff] %v1854_v4   ;;  %v455_v10 = vadd.f32 %v454_v6, %v2185_v47  ;;  %v624_v11 = vadd.f32 %v623_v7, %v2187_v48 }
 0x151   :  { %v1071_v8 = vpop.f32.mrf.mxu2  ;;  %v1240_v9 = vpop.f32.mrf.mxu3 }
 0x152   :  { %1681 = vmatmul.msk.bf16.gmra.mxu0 %vm281_vm1, %v1809_v5  ;;  %1713 = vmatmul.msk.bf16.gmra.mxu1 %vm281_vm1, %v1809_v5  ;;  %v1072_v14 = vadd.f32 %v2275_v62, %v1071_v8  ;;  %v771_v17 = vmax.f32 %v455_v10, 0.0  ;;  %v772_v20 = vmax.f32 %v624_v11, 0.0 }
 0x154   :  { %v1241_v24 = vadd.f32 %v1240_v9, %v1072_v14 }
 0x157   :  { %v456_v12 = vpop.f32.mrf.mxu0  ;;  %v625_v13 = vpop.f32.mrf.mxu1 }
 0x158   :  { %v457_v15 = vadd.f32 %v456_v12, %v2185_v47  ;;  %v626_v16 = vadd.f32 %v625_v13, %v2187_v48 }
 0x159   :  { %v1073_v18 = vpop.f32.mrf.mxu2  ;;  %v1242_v19 = vpop.f32.mrf.mxu3 }
 0x15a   :  { %v773_v21 = vmax.f32 %v457_v15, 0.0  ;;  %v774_v22 = vmax.f32 %v626_v16, 0.0  ;;  %v1074_v23 = vadd.f32 %v2275_v62, %v1073_v18  ;;  %v1812_v16 = vld [vmem:[%s2605_s0 + $0xb8] sm:$0xff] }
 0x15c   :  { %v1243_v25 = vadd.f32 %v1242_v19, %v1074_v23  ;;  %v875_v26 = vpack.c.bf16 %v773_v21, %v771_v17  ;;  %v876_v27 = vpack.c.bf16 %v774_v22, %v772_v20 }
 0x15e   :  { %v1859_v28 = vpack.c.bf16 %v1243_v25, %v1241_v24  ;;  %1115 = vmatmul.bf16.gmra.mxu2 %v875_v26  ;;  %1284 = vmatmul.bf16.gmra.mxu3 %v876_v27 }
 0x15f   :  { %v459_v30 = vpop.f32.mrf.mxu0  ;;  %v628_v31 = vpop.f32.mrf.mxu1 }
 0x160   :  { %2003 = vst [vmem:[%s2609_s5 + $0x18] sm:$0xff] %v1859_v28   ;;  %v460_v34 = vadd.f32 %v459_v30, %v2185_v47  ;;  %v629_v35 = vadd.f32 %v628_v31, %v2187_v48 }
 0x161   :  { %v1076_v32 = vpop.f32.mrf.mxu2  ;;  %v1245_v33 = vpop.f32.mrf.mxu3 }
 0x162   :  { %1682 = vmatmul.msk.bf16.gmra.mxu0 %vm281_vm1, %v1810_v29  ;;  %1714 = vmatmul.msk.bf16.gmra.mxu1 %vm281_vm1, %v1810_v29  ;;  %v1077_v38 = vadd.f32 %v2275_v62, %v1076_v32  ;;  %v775_v41 = vmax.f32 %v460_v34, 0.0  ;;  %v776_v44 = vmax.f32 %v629_v35, 0.0 }
 0x164   :  { %v1246_v50 = vadd.f32 %v1245_v33, %v1077_v38 }
 0x167   :  { %v461_v36 = vpop.f32.mrf.mxu0  ;;  %v630_v37 = vpop.f32.mrf.mxu1 }
 0x168   :  { %v462_v39 = vadd.f32 %v461_v36, %v2185_v47  ;;  %v631_v40 = vadd.f32 %v630_v37, %v2187_v48 }
 0x169   :  { %v1078_v42 = vpop.f32.mrf.mxu2  ;;  %v1247_v43 = vpop.f32.mrf.mxu3 }
 0x16a   :  { %v777_v45 = vmax.f32 %v462_v39, 0.0  ;;  %v778_v46 = vmax.f32 %v631_v40, 0.0  ;;  %v1079_v49 = vadd.f32 %v2275_v62, %v1078_v42  ;;  %v1813_v40 = vld [vmem:[%s2605_s0 + $0xc0] sm:$0xff] }
 0x16c   :  { %v1248_v51 = vadd.f32 %v1247_v43, %v1079_v49  ;;  %v877_v52 = vpack.c.bf16 %v777_v45, %v775_v41  ;;  %v878_v53 = vpack.c.bf16 %v778_v46, %v776_v44 }
 0x16e   :  { %v1864_v54 = vpack.c.bf16 %v1248_v51, %v1246_v50  ;;  %1120 = vmatmul.bf16.gmra.mxu2 %v877_v52  ;;  %1289 = vmatmul.bf16.gmra.mxu3 %v878_v53 }
 0x16f   :  { %v464_v56 = vpop.f32.mrf.mxu0  ;;  %v633_v57 = vpop.f32.mrf.mxu1 }
 0x170   :  { %2004 = vst [vmem:[%s2609_s5 + $0x20] sm:$0xff] %v1864_v54   ;;  %v465_v60 = vadd.f32 %v464_v56, %v2185_v47  ;;  %v634_v61 = vadd.f32 %v633_v57, %v2187_v48 }
 0x171   :  { %v1081_v58 = vpop.f32.mrf.mxu2  ;;  %v1250_v59 = vpop.f32.mrf.mxu3 }
 0x172   :  { %1683 = vmatmul.msk.bf16.gmra.mxu0 %vm281_vm1, %v1811_v55  ;;  %1715 = vmatmul.msk.bf16.gmra.mxu1 %vm281_vm1, %v1811_v55  ;;  %v1082_v1 = vadd.f32 %v2275_v62, %v1081_v58  ;;  %v779_v4 = vmax.f32 %v465_v60, 0.0  ;;  %v780_v7 = vmax.f32 %v634_v61, 0.0 }
 0x174   :  { %v1251_v11 = vadd.f32 %v1250_v59, %v1082_v1 }
 0x177   :  { %v466_v63 = vpop.f32.mrf.mxu0  ;;  %v635_v0 = vpop.f32.mrf.mxu1 }
 0x178   :  { %v467_v2 = vadd.f32 %v466_v63, %v2185_v47  ;;  %v636_v3 = vadd.f32 %v635_v0, %v2187_v48 }
 0x179   :  { %v1083_v5 = vpop.f32.mrf.mxu2  ;;  %v1252_v6 = vpop.f32.mrf.mxu3 }
 0x17a   :  { %v781_v8 = vmax.f32 %v467_v2, 0.0  ;;  %v782_v9 = vmax.f32 %v636_v3, 0.0  ;;  %v1084_v10 = vadd.f32 %v2275_v62, %v1083_v5  ;;  %v1814_v3 = vld [vmem:[%s2605_s0 + $0xc8] sm:$0xff] }
 0x17c   :  { %v1253_v12 = vadd.f32 %v1252_v6, %v1084_v10  ;;  %v879_v13 = vpack.c.bf16 %v781_v8, %v779_v4  ;;  %v880_v14 = vpack.c.bf16 %v782_v9, %v780_v7 }
 0x17e   :  { %v1869_v15 = vpack.c.bf16 %v1253_v12, %v1251_v11  ;;  %1125 = vmatmul.bf16.gmra.mxu2 %v879_v13  ;;  %1294 = vmatmul.bf16.gmra.mxu3 %v880_v14 }
 0x17f   :  { %v469_v17 = vpop.f32.mrf.mxu0  ;;  %v638_v18 = vpop.f32.mrf.mxu1 }
 0x180   :  { %2005 = vst [vmem:[%s2609_s5 + $0x28] sm:$0xff] %v1869_v15   ;;  %v470_v21 = vadd.f32 %v469_v17, %v2185_v47  ;;  %v639_v22 = vadd.f32 %v638_v18, %v2187_v48 }
 0x181   :  { %v1086_v19 = vpop.f32.mrf.mxu2  ;;  %v1255_v20 = vpop.f32.mrf.mxu3 }
 0x182   :  { %1684 = vmatmul.msk.bf16.gmra.mxu0 %vm281_vm1, %v1812_v16  ;;  %1716 = vmatmul.msk.bf16.gmra.mxu1 %vm281_vm1, %v1812_v16  ;;  %v1087_v25 = vadd.f32 %v2275_v62, %v1086_v19  ;;  %v783_v28 = vmax.f32 %v470_v21, 0.0  ;;  %v784_v31 = vmax.f32 %v639_v22, 0.0 }
 0x184   :  { %v1256_v35 = vadd.f32 %v1255_v20, %v1087_v25 }
 0x187   :  { %v471_v23 = vpop.f32.mrf.mxu0  ;;  %v640_v24 = vpop.f32.mrf.mxu1 }
 0x188   :  { %v472_v26 = vadd.f32 %v471_v23, %v2185_v47  ;;  %v641_v27 = vadd.f32 %v640_v24, %v2187_v48 }
 0x189   :  { %v1088_v29 = vpop.f32.mrf.mxu2  ;;  %v1257_v30 = vpop.f32.mrf.mxu3 }
 0x18a   :  { %v785_v32 = vmax.f32 %v472_v26, 0.0  ;;  %v786_v33 = vmax.f32 %v641_v27, 0.0  ;;  %v1089_v34 = vadd.f32 %v2275_v62, %v1088_v29  ;;  %v1815_v27 = vld [vmem:[%s2605_s0 + $0xd0] sm:$0xff] }
 0x18c   :  { %v1258_v36 = vadd.f32 %v1257_v30, %v1089_v34  ;;  %v881_v37 = vpack.c.bf16 %v785_v32, %v783_v28  ;;  %v882_v38 = vpack.c.bf16 %v786_v33, %v784_v31 }
 0x18e   :  { %v1874_v39 = vpack.c.bf16 %v1258_v36, %v1256_v35  ;;  %1130 = vmatmul.bf16.gmra.mxu2 %v881_v37  ;;  %1299 = vmatmul.bf16.gmra.mxu3 %v882_v38 }
 0x18f   :  { %v474_v41 = vpop.f32.mrf.mxu0  ;;  %v643_v42 = vpop.f32.mrf.mxu1 }
 0x190   :  { %2006 = vst [vmem:[%s2609_s5 + $0x30] sm:$0xff] %v1874_v39   ;;  %v475_v45 = vadd.f32 %v474_v41, %v2185_v47  ;;  %v644_v46 = vadd.f32 %v643_v42, %v2187_v48 }
 0x191   :  { %v1091_v43 = vpop.f32.mrf.mxu2  ;;  %v1260_v44 = vpop.f32.mrf.mxu3 }
 0x192   :  { %1685 = vmatmul.msk.bf16.gmra.mxu0 %vm281_vm1, %v1813_v40  ;;  %1717 = vmatmul.msk.bf16.gmra.mxu1 %vm281_vm1, %v1813_v40  ;;  %v1092_v51 = vadd.f32 %v2275_v62, %v1091_v43  ;;  %v787_v54 = vmax.f32 %v475_v45, 0.0  ;;  %v788_v57 = vmax.f32 %v644_v46, 0.0 }
 0x194   :  { %v1261_v61 = vadd.f32 %v1260_v44, %v1092_v51 }
 0x197   :  { %v476_v49 = vpop.f32.mrf.mxu0  ;;  %v645_v50 = vpop.f32.mrf.mxu1 }
 0x198   :  { %v477_v52 = vadd.f32 %v476_v49, %v2185_v47  ;;  %v646_v53 = vadd.f32 %v645_v50, %v2187_v48 }
 0x199   :  { %v1093_v55 = vpop.f32.mrf.mxu2  ;;  %v1262_v56 = vpop.f32.mrf.mxu3 }
 0x19a   :  { %v789_v58 = vmax.f32 %v477_v52, 0.0  ;;  %v790_v59 = vmax.f32 %v646_v53, 0.0  ;;  %v1094_v60 = vadd.f32 %v2275_v62, %v1093_v55  ;;  %v1816_v53 = vld [vmem:[%s2605_s0 + $0xd8] sm:$0xff] }
 0x19c   :  { %v1263_v63 = vadd.f32 %v1262_v56, %v1094_v60  ;;  %v883_v0 = vpack.c.bf16 %v789_v58, %v787_v54  ;;  %v884_v1 = vpack.c.bf16 %v790_v59, %v788_v57 }
 0x19e   :  { %v1879_v2 = vpack.c.bf16 %v1263_v63, %v1261_v61  ;;  %1135 = vmatmul.bf16.gmra.mxu2 %v883_v0  ;;  %1304 = vmatmul.bf16.gmra.mxu3 %v884_v1 }
 0x19f   :  { %v479_v4 = vpop.f32.mrf.mxu0  ;;  %v648_v5 = vpop.f32.mrf.mxu1 }
 0x1a0   :  { %2007 = vst [vmem:[%s2609_s5 + $0x38] sm:$0xff] %v1879_v2   ;;  %v480_v8 = vadd.f32 %v479_v4, %v2185_v47  ;;  %v649_v9 = vadd.f32 %v648_v5, %v2187_v48 }
 0x1a1   :  { %v1096_v6 = vpop.f32.mrf.mxu2  ;;  %v1265_v7 = vpop.f32.mrf.mxu3 }
 0x1a2   :  { %1686 = vmatmul.msk.bf16.gmra.mxu0 %vm281_vm1, %v1814_v3  ;;  %1718 = vmatmul.msk.bf16.gmra.mxu1 %vm281_vm1, %v1814_v3  ;;  %v1097_v12 = vadd.f32 %v2275_v62, %v1096_v6  ;;  %v791_v15 = vmax.f32 %v480_v8, 0.0  ;;  %v792_v18 = vmax.f32 %v649_v9, 0.0 }
 0x1a4   :  { %v1266_v22 = vadd.f32 %v1265_v7, %v1097_v12 }
 0x1a7   :  { %v481_v10 = vpop.f32.mrf.mxu0  ;;  %v650_v11 = vpop.f32.mrf.mxu1 }
 0x1a8   :  { %v482_v13 = vadd.f32 %v481_v10, %v2185_v47  ;;  %v651_v14 = vadd.f32 %v650_v11, %v2187_v48 }
 0x1a9   :  { %v1098_v16 = vpop.f32.mrf.mxu2  ;;  %v1267_v17 = vpop.f32.mrf.mxu3 }
 0x1aa   :  { %v793_v19 = vmax.f32 %v482_v13, 0.0  ;;  %v794_v20 = vmax.f32 %v651_v14, 0.0  ;;  %v1099_v21 = vadd.f32 %v2275_v62, %v1098_v16  ;;  %v1817_v14 = vld [vmem:[%s2605_s0 + $0xe0] sm:$0xff] }
 0x1ac   :  { %v1268_v23 = vadd.f32 %v1267_v17, %v1099_v21  ;;  %v885_v24 = vpack.c.bf16 %v793_v19, %v791_v15  ;;  %v886_v25 = vpack.c.bf16 %v794_v20, %v792_v18 }
 0x1ae   :  { %v1884_v26 = vpack.c.bf16 %v1268_v23, %v1266_v22  ;;  %1140 = vmatmul.bf16.gmra.mxu2 %v885_v24  ;;  %1309 = vmatmul.bf16.gmra.mxu3 %v886_v25 }
 0x1af   :  { %v484_v28 = vpop.f32.mrf.mxu0  ;;  %v653_v29 = vpop.f32.mrf.mxu1 }
 0x1b0   :  { %2008 = vst [vmem:[%s2609_s5 + $0x40] sm:$0xff] %v1884_v26   ;;  %v485_v32 = vadd.f32 %v484_v28, %v2185_v47  ;;  %v654_v33 = vadd.f32 %v653_v29, %v2187_v48 }
 0x1b1   :  { %v1101_v30 = vpop.f32.mrf.mxu2  ;;  %v1270_v31 = vpop.f32.mrf.mxu3 }
 0x1b2   :  { %1687 = vmatmul.msk.bf16.gmra.mxu0 %vm281_vm1, %v1815_v27  ;;  %1719 = vmatmul.msk.bf16.gmra.mxu1 %vm281_vm1, %v1815_v27  ;;  %v1102_v36 = vadd.f32 %v2275_v62, %v1101_v30  ;;  %v795_v39 = vmax.f32 %v485_v32, 0.0  ;;  %v796_v42 = vmax.f32 %v654_v33, 0.0 }
 0x1b4   :  { %v1271_v46 = vadd.f32 %v1270_v31, %v1102_v36 }
 0x1b7   :  { %v486_v34 = vpop.f32.mrf.mxu0  ;;  %v655_v35 = vpop.f32.mrf.mxu1 }
 0x1b8   :  { %v487_v37 = vadd.f32 %v486_v34, %v2185_v47  ;;  %v656_v38 = vadd.f32 %v655_v35, %v2187_v48 }
 0x1b9   :  { %v1103_v40 = vpop.f32.mrf.mxu2  ;;  %v1272_v41 = vpop.f32.mrf.mxu3 }
 0x1ba   :  { %v797_v43 = vmax.f32 %v487_v37, 0.0  ;;  %v798_v44 = vmax.f32 %v656_v38, 0.0  ;;  %v1104_v45 = vadd.f32 %v2275_v62, %v1103_v40  ;;  %v1818_v38 = vld [vmem:[%s2605_s0 + $0xe8] sm:$0xff] }
 0x1bc   :  { %v1273_v49 = vadd.f32 %v1272_v41, %v1104_v45  ;;  %v887_v50 = vpack.c.bf16 %v797_v43, %v795_v39  ;;  %v888_v51 = vpack.c.bf16 %v798_v44, %v796_v42 }
 0x1be   :  { %v1889_v52 = vpack.c.bf16 %v1273_v49, %v1271_v46  ;;  %1145 = vmatmul.bf16.gmra.mxu2 %v887_v50  ;;  %1314 = vmatmul.bf16.gmra.mxu3 %v888_v51 }
 0x1bf   :  { %v489_v54 = vpop.f32.mrf.mxu0  ;;  %v658_v55 = vpop.f32.mrf.mxu1 }
 0x1c0   :  { %2009 = vst [vmem:[%s2609_s5 + $0x48] sm:$0xff] %v1889_v52   ;;  %v490_v58 = vadd.f32 %v489_v54, %v2185_v47  ;;  %v659_v59 = vadd.f32 %v658_v55, %v2187_v48 }
 0x1c1   :  { %v1106_v56 = vpop.f32.mrf.mxu2  ;;  %v1275_v57 = vpop.f32.mrf.mxu3 }
 0x1c2   :  { %1688 = vmatmul.msk.bf16.gmra.mxu0 %vm281_vm1, %v1816_v53  ;;  %1720 = vmatmul.msk.bf16.gmra.mxu1 %vm281_vm1, %v1816_v53  ;;  %v1107_v63 = vadd.f32 %v2275_v62, %v1106_v56  ;;  %v799_v2 = vmax.f32 %v490_v58, 0.0  ;;  %v800_v5 = vmax.f32 %v659_v59, 0.0 }
 0x1c4   :  { %v1276_v9 = vadd.f32 %v1275_v57, %v1107_v63 }
 0x1c7   :  { %v491_v60 = vpop.f32.mrf.mxu0  ;;  %v660_v61 = vpop.f32.mrf.mxu1 }
 0x1c8   :  { %v492_v0 = vadd.f32 %v491_v60, %v2185_v47  ;;  %v661_v1 = vadd.f32 %v660_v61, %v2187_v48 }
 0x1c9   :  { %v1108_v3 = vpop.f32.mrf.mxu2  ;;  %v1277_v4 = vpop.f32.mrf.mxu3 }
 0x1ca   :  { %v801_v6 = vmax.f32 %v492_v0, 0.0  ;;  %v802_v7 = vmax.f32 %v661_v1, 0.0  ;;  %v1109_v8 = vadd.f32 %v2275_v62, %v1108_v3  ;;  %v1819_v1 = vld [vmem:[%s2605_s0 + $0xf0] sm:$0xff] }
 0x1cc   :  { %v1278_v10 = vadd.f32 %v1277_v4, %v1109_v8  ;;  %v889_v11 = vpack.c.bf16 %v801_v6, %v799_v2  ;;  %v890_v12 = vpack.c.bf16 %v802_v7, %v800_v5 }
 0x1ce   :  { %v1894_v13 = vpack.c.bf16 %v1278_v10, %v1276_v9  ;;  %1150 = vmatmul.bf16.gmra.mxu2 %v889_v11  ;;  %1319 = vmatmul.bf16.gmra.mxu3 %v890_v12 }
 0x1cf   :  { %v494_v15 = vpop.f32.mrf.mxu0  ;;  %v663_v16 = vpop.f32.mrf.mxu1 }
 0x1d0   :  { %2010 = vst [vmem:[%s2609_s5 + $0x50] sm:$0xff] %v1894_v13   ;;  %v495_v19 = vadd.f32 %v494_v15, %v2185_v47  ;;  %v664_v20 = vadd.f32 %v663_v16, %v2187_v48 }
 0x1d1   :  { %v1111_v17 = vpop.f32.mrf.mxu2  ;;  %v1280_v18 = vpop.f32.mrf.mxu3 }
 0x1d2   :  { %1689 = vmatmul.msk.bf16.gmra.mxu0 %vm281_vm1, %v1817_v14  ;;  %1721 = vmatmul.msk.bf16.gmra.mxu1 %vm281_vm1, %v1817_v14  ;;  %v1112_v23 = vadd.f32 %v2275_v62, %v1111_v17  ;;  %v803_v26 = vmax.f32 %v495_v19, 0.0  ;;  %v804_v29 = vmax.f32 %v664_v20, 0.0 }
 0x1d4   :  { %v1281_v33 = vadd.f32 %v1280_v18, %v1112_v23 }
 0x1d7   :  { %v496_v21 = vpop.f32.mrf.mxu0  ;;  %v665_v22 = vpop.f32.mrf.mxu1 }
 0x1d8   :  { %v497_v24 = vadd.f32 %v496_v21, %v2185_v47  ;;  %v666_v25 = vadd.f32 %v665_v22, %v2187_v48 }
 0x1d9   :  { %v1113_v27 = vpop.f32.mrf.mxu2  ;;  %v1282_v28 = vpop.f32.mrf.mxu3 }
 0x1da   :  { %v805_v30 = vmax.f32 %v497_v24, 0.0  ;;  %v806_v31 = vmax.f32 %v666_v25, 0.0  ;;  %v1114_v32 = vadd.f32 %v2275_v62, %v1113_v27  ;;  %v1820_v25 = vld [vmem:[%s2605_s0 + $0xf8] sm:$0xff] }
 0x1dc   :  { %v891_v34 = vpack.c.bf16 %v805_v30, %v803_v26  ;;  %v892_v35 = vpack.c.bf16 %v806_v31, %v804_v29  ;;  %v1283_v36 = vadd.f32 %v1282_v28, %v1114_v32 }
 0x1de   :  { %v1899_v37 = vpack.c.bf16 %v1283_v36, %v1281_v33  ;;  %1155 = vmatmul.bf16.gmra.mxu2 %v891_v34  ;;  %1324 = vmatmul.bf16.gmra.mxu3 %v892_v35 }
 0x1df   :  { %v499_v39 = vpop.f32.mrf.mxu0  ;;  %v668_v40 = vpop.f32.mrf.mxu1 }
 0x1e0   :  { %2011 = vst [vmem:[%s2609_s5 + $0x58] sm:$0xff] %v1899_v37   ;;  %v500_v43 = vadd.f32 %v499_v39, %v2185_v47  ;;  %v669_v44 = vadd.f32 %v668_v40, %v2187_v48 }
 0x1e1   :  { %v1116_v41 = vpop.f32.mrf.mxu2  ;;  %v1285_v42 = vpop.f32.mrf.mxu3 }
 0x1e2   :  { %1690 = vmatmul.msk.bf16.gmra.mxu0 %vm281_vm1, %v1818_v38  ;;  %1722 = vmatmul.msk.bf16.gmra.mxu1 %vm281_vm1, %v1818_v38  ;;  %v1117_v49 = vadd.f32 %v2275_v62, %v1116_v41  ;;  %v807_v52 = vmax.f32 %v500_v43, 0.0  ;;  %v808_v55 = vmax.f32 %v669_v44, 0.0 }
 0x1e4   :  { %v1286_v59 = vadd.f32 %v1285_v42, %v1117_v49 }
 0x1e7   :  { %v501_v45 = vpop.f32.mrf.mxu0  ;;  %v670_v46 = vpop.f32.mrf.mxu1 }
 0x1e8   :  { %v502_v50 = vadd.f32 %v501_v45, %v2185_v47  ;;  %v671_v51 = vadd.f32 %v670_v46, %v2187_v48 }
 0x1e9   :  { %v1118_v53 = vpop.f32.mrf.mxu2  ;;  %v1287_v54 = vpop.f32.mrf.mxu3 }
 0x1ea   :  { %v809_v56 = vmax.f32 %v502_v50, 0.0  ;;  %v810_v57 = vmax.f32 %v671_v51, 0.0  ;;  %v1119_v58 = vadd.f32 %v2275_v62, %v1118_v53 }
 0x1ec   :  { %v893_v60 = vpack.c.bf16 %v809_v56, %v807_v52  ;;  %v894_v61 = vpack.c.bf16 %v810_v57, %v808_v55  ;;  %v1288_v63 = vadd.f32 %v1287_v54, %v1119_v58 }
 0x1ee   :  { %v1904_v0 = vpack.c.bf16 %v1288_v63, %v1286_v59  ;;  %1160 = vmatmul.bf16.gmra.mxu2 %v893_v60  ;;  %1329 = vmatmul.bf16.gmra.mxu3 %v894_v61 }
 0x1ef   :  { %v504_v2 = vpop.f32.mrf.mxu0  ;;  %v673_v3 = vpop.f32.mrf.mxu1 }
 0x1f0   :  { %2012 = vst [vmem:[%s2609_s5 + $0x60] sm:$0xff] %v1904_v0   ;;  %v505_v6 = vadd.f32 %v504_v2, %v2185_v47  ;;  %v674_v7 = vadd.f32 %v673_v3, %v2187_v48 }
 0x1f1   :  { %v1121_v4 = vpop.f32.mrf.mxu2  ;;  %v1290_v5 = vpop.f32.mrf.mxu3 }
 0x1f2   :  { %1691 = vmatmul.msk.bf16.gmra.mxu0 %vm281_vm1, %v1819_v1  ;;  %1723 = vmatmul.msk.bf16.gmra.mxu1 %vm281_vm1, %v1819_v1  ;;  %v1122_v10 = vadd.f32 %v2275_v62, %v1121_v4  ;;  %v811_v13 = vmax.f32 %v505_v6, 0.0  ;;  %v812_v16 = vmax.f32 %v674_v7, 0.0 }
 0x1f4   :  { %v1291_v20 = vadd.f32 %v1290_v5, %v1122_v10 }
 0x1f7   :  { %v506_v8 = vpop.f32.mrf.mxu0  ;;  %v675_v9 = vpop.f32.mrf.mxu1 }
 0x1f8   :  { %v507_v11 = vadd.f32 %v506_v8, %v2185_v47  ;;  %v676_v12 = vadd.f32 %v675_v9, %v2187_v48 }
 0x1f9   :  { %v1123_v14 = vpop.f32.mrf.mxu2  ;;  %v1292_v15 = vpop.f32.mrf.mxu3 }
 0x1fa   :  { %v813_v17 = vmax.f32 %v507_v11, 0.0  ;;  %v814_v18 = vmax.f32 %v676_v12, 0.0  ;;  %v1124_v19 = vadd.f32 %v2275_v62, %v1123_v14 }
 0x1fc   :  { %v895_v21 = vpack.c.bf16 %v813_v17, %v811_v13  ;;  %v896_v22 = vpack.c.bf16 %v814_v18, %v812_v16  ;;  %v1293_v23 = vadd.f32 %v1292_v15, %v1124_v19 }
 0x1fe   :  { %v1909_v24 = vpack.c.bf16 %v1293_v23, %v1291_v20  ;;  %1165 = vmatmul.bf16.gmra.mxu2 %v895_v21  ;;  %1334 = vmatmul.bf16.gmra.mxu3 %v896_v22 }
 0x1ff   :  { %v509_v26 = vpop.f32.mrf.mxu0  ;;  %v678_v27 = vpop.f32.mrf.mxu1 }
 0x200   :  { %2013 = vst [vmem:[%s2609_s5 + $0x68] sm:$0xff] %v1909_v24   ;;  %v510_v30 = vadd.f32 %v509_v26, %v2185_v47  ;;  %v679_v31 = vadd.f32 %v678_v27, %v2187_v48 }
 0x201   :  { %v1126_v28 = vpop.f32.mrf.mxu2  ;;  %v1295_v29 = vpop.f32.mrf.mxu3 }
 0x202   :  { %1692 = vmatmul.msk.bf16.gmra.mxu0 %vm281_vm1, %v1820_v25  ;;  %1724 = vmatmul.msk.bf16.gmra.mxu1 %vm281_vm1, %v1820_v25  ;;  %v1127_v34 = vadd.f32 %v2275_v62, %v1126_v28  ;;  %v815_v37 = vmax.f32 %v510_v30, 0.0  ;;  %v816_v40 = vmax.f32 %v679_v31, 0.0 }
 0x204   :  { %v1296_v44 = vadd.f32 %v1295_v29, %v1127_v34 }
 0x207   :  { %v511_v32 = vpop.f32.mrf.mxu0  ;;  %v680_v33 = vpop.f32.mrf.mxu1 }
 0x208   :  { %v512_v35 = vadd.f32 %v511_v32, %v2185_v47  ;;  %v681_v36 = vadd.f32 %v680_v33, %v2187_v48 }
 0x209   :  { %v1128_v38 = vpop.f32.mrf.mxu2  ;;  %v1297_v39 = vpop.f32.mrf.mxu3 }
 0x20a   :  { %v817_v41 = vmax.f32 %v512_v35, 0.0  ;;  %v818_v42 = vmax.f32 %v681_v36, 0.0  ;;  %v1129_v43 = vadd.f32 %v2275_v62, %v1128_v38 }
 0x20c   :  { %v897_v45 = vpack.c.bf16 %v817_v41, %v815_v37  ;;  %v898_v46 = vpack.c.bf16 %v818_v42, %v816_v40  ;;  %v1298_v49 = vadd.f32 %v1297_v39, %v1129_v43 }
 0x20e   :  { %v1914_v50 = vpack.c.bf16 %v1298_v49, %v1296_v44  ;;  %1170 = vmatmul.bf16.gmra.mxu2 %v897_v45  ;;  %1339 = vmatmul.bf16.gmra.mxu3 %v898_v46 }
 0x20f   :  { %v514_v51 = vpop.f32.mrf.mxu0  ;;  %v683_v52 = vpop.f32.mrf.mxu1 }
 0x210   :  { %2014 = vst [vmem:[%s2609_s5 + $0x70] sm:$0xff] %v1914_v50   ;;  %v515_v55 = vadd.f32 %v514_v51, %v2185_v47  ;;  %v684_v56 = vadd.f32 %v683_v52, %v2187_v48 }
 0x211   :  { %v1131_v53 = vpop.f32.mrf.mxu2  ;;  %v1300_v54 = vpop.f32.mrf.mxu3 }
 0x212   :  { %v1132_v59 = vadd.f32 %v2275_v62, %v1131_v53  ;;  %v819_v63 = vmax.f32 %v515_v55, 0.0  ;;  %v820_v2 = vmax.f32 %v684_v56, 0.0 }
 0x214   :  { %v1301_v6 = vadd.f32 %v1300_v54, %v1132_v59 }
 0x217   :  { %v516_v57 = vpop.f32.mrf.mxu0  ;;  %v685_v58 = vpop.f32.mrf.mxu1 }
 0x218   :  { %v517_v60 = vadd.f32 %v516_v57, %v2185_v47  ;;  %v686_v61 = vadd.f32 %v685_v58, %v2187_v48 }
 0x219   :  { %v1133_v0 = vpop.f32.mrf.mxu2  ;;  %v1302_v1 = vpop.f32.mrf.mxu3 }
 0x21a   :  { %v821_v3 = vmax.f32 %v517_v60, 0.0  ;;  %v822_v4 = vmax.f32 %v686_v61, 0.0  ;;  %v1134_v5 = vadd.f32 %v2275_v62, %v1133_v0 }
 0x21c   :  { %v899_v7 = vpack.c.bf16 %v821_v3, %v819_v63  ;;  %v900_v8 = vpack.c.bf16 %v822_v4, %v820_v2  ;;  %v1303_v9 = vadd.f32 %v1302_v1, %v1134_v5  ;;  %v2514_v3 = vld [vmem:[%s2608_s4] ss:$0 sm:$0xff] }
 0x21e   :  { %v1919_v10 = vpack.c.bf16 %v1303_v9, %v1301_v6  ;;  %1175 = vmatmul.bf16.gmra.mxu2 %v899_v7  ;;  %1344 = vmatmul.bf16.gmra.mxu3 %v900_v8 }
 0x21f   :  { %v519_v11 = vpop.f32.mrf.mxu0  ;;  %v688_v12 = vpop.f32.mrf.mxu1 }
 0x220   :  { %2015 = vst [vmem:[%s2609_s5 + $0x78] sm:$0xff] %v1919_v10   ;;  %v520_v15 = vadd.f32 %v519_v11, %v2185_v47  ;;  %v689_v16 = vadd.f32 %v688_v12, %v2187_v48 }
 0x221   :  { %v1136_v13 = vpop.f32.mrf.mxu2  ;;  %v1305_v14 = vpop.f32.mrf.mxu3 }
 0x222   :  { %v1137_v19 = vadd.f32 %v2275_v62, %v1136_v13  ;;  %v823_v22 = vmax.f32 %v520_v15, 0.0  ;;  %v824_v25 = vmax.f32 %v689_v16, 0.0 }
 0x224   :  { %v1306_v29 = vadd.f32 %v1305_v14, %v1137_v19 }
 0x227   :  { %v521_v17 = vpop.f32.mrf.mxu0  ;;  %v690_v18 = vpop.f32.mrf.mxu1 }
 0x228   :  { %v522_v20 = vadd.f32 %v521_v17, %v2185_v47  ;;  %v691_v21 = vadd.f32 %v690_v18, %v2187_v48 }
 0x229   :  { %v1138_v23 = vpop.f32.mrf.mxu2  ;;  %v1307_v24 = vpop.f32.mrf.mxu3 }
 0x22a   :  { %v825_v26 = vmax.f32 %v522_v20, 0.0  ;;  %v826_v27 = vmax.f32 %v691_v21, 0.0  ;;  %v1139_v28 = vadd.f32 %v2275_v62, %v1138_v23 }
 0x22c   :  { %v901_v30 = vpack.c.bf16 %v825_v26, %v823_v22  ;;  %v902_v31 = vpack.c.bf16 %v826_v27, %v824_v25  ;;  %v1308_v32 = vadd.f32 %v1307_v24, %v1139_v28 }
 0x22e   :  { %v1924_v33 = vpack.c.bf16 %v1308_v32, %v1306_v29  ;;  %1180 = vmatmul.bf16.gmra.mxu2 %v901_v30  ;;  %1349 = vmatmul.bf16.gmra.mxu3 %v902_v31 }
 0x22f   :  { %v524_v34 = vpop.f32.mrf.mxu0  ;;  %v693_v35 = vpop.f32.mrf.mxu1 }
 0x230   :  { %2016 = vst [vmem:[%s2609_s5 + $0x80] sm:$0xff] %v1924_v33   ;;  %v525_v38 = vadd.f32 %v524_v34, %v2185_v47  ;;  %v694_v39 = vadd.f32 %v693_v35, %v2187_v48 }
 0x231   :  { %v1141_v36 = vpop.f32.mrf.mxu2  ;;  %v1310_v37 = vpop.f32.mrf.mxu3 }
 0x232   :  { %v1142_v42 = vadd.f32 %v2275_v62, %v1141_v36  ;;  %v827_v45 = vmax.f32 %v525_v38, 0.0  ;;  %v828_v50 = vmax.f32 %v694_v39, 0.0 }
 0x234   :  { %v1311_v54 = vadd.f32 %v1310_v37, %v1142_v42 }
 0x237   :  { %v526_v40 = vpop.f32.mrf.mxu0  ;;  %v695_v41 = vpop.f32.mrf.mxu1 }
 0x238   :  { %v527_v43 = vadd.f32 %v526_v40, %v2185_v47  ;;  %v696_v44 = vadd.f32 %v695_v41, %v2187_v48 }
 0x239   :  { %v1143_v46 = vpop.f32.mrf.mxu2  ;;  %v1312_v49 = vpop.f32.mrf.mxu3 }
 0x23a   :  { %v829_v51 = vmax.f32 %v527_v43, 0.0  ;;  %v830_v52 = vmax.f32 %v696_v44, 0.0  ;;  %v1144_v53 = vadd.f32 %v2275_v62, %v1143_v46 }
 0x23c   :  { %v903_v55 = vpack.c.bf16 %v829_v51, %v827_v45  ;;  %v904_v56 = vpack.c.bf16 %v830_v52, %v828_v50  ;;  %v1313_v57 = vadd.f32 %v1312_v49, %v1144_v53 }
 0x23e   :  { %v1929_v58 = vpack.c.bf16 %v1313_v57, %v1311_v54  ;;  %1185 = vmatmul.bf16.gmra.mxu2 %v903_v55  ;;  %1354 = vmatmul.bf16.gmra.mxu3 %v904_v56 }
 0x23f   :  { %v529_v59 = vpop.f32.mrf.mxu0  ;;  %v698_v60 = vpop.f32.mrf.mxu1 }
 0x240   :  { %2017 = vst [vmem:[%s2609_s5 + $0x88] sm:$0xff] %v1929_v58   ;;  %v530_v0 = vadd.f32 %v529_v59, %v2185_v47  ;;  %v699_v1 = vadd.f32 %v698_v60, %v2187_v48 }
 0x241   :  { %v1146_v61 = vpop.f32.mrf.mxu2  ;;  %v1315_v63 = vpop.f32.mrf.mxu3 }
 0x242   :  { %v1147_v4 = vadd.f32 %v2514_v3, %v1146_v61  ;;  %v831_v7 = vmax.f32 %v530_v0, 0.0  ;;  %v832_v10 = vmax.f32 %v699_v1, 0.0 }
 0x244   :  { %v1316_v14 = vadd.f32 %v1315_v63, %v1147_v4 }
 0x247   :  { %v531_v62 = vpop.f32.mrf.mxu0  ;;  %v700_v2 = vpop.f32.mrf.mxu1 }
 0x248   :  { %v532_v5 = vadd.f32 %v531_v62, %v2185_v47  ;;  %v701_v6 = vadd.f32 %v700_v2, %v2187_v48 }
 0x249   :  { %v1148_v8 = vpop.f32.mrf.mxu2  ;;  %v1317_v9 = vpop.f32.mrf.mxu3 }
 0x24a   :  { %v833_v11 = vmax.f32 %v532_v5, 0.0  ;;  %v834_v12 = vmax.f32 %v701_v6, 0.0  ;;  %v1149_v13 = vadd.f32 %v2514_v3, %v1148_v8 }
 0x24c   :  { %v905_v15 = vpack.c.bf16 %v833_v11, %v831_v7  ;;  %v906_v16 = vpack.c.bf16 %v834_v12, %v832_v10  ;;  %v1318_v17 = vadd.f32 %v1317_v9, %v1149_v13 }
 0x24e   :  { %v1934_v18 = vpack.c.bf16 %v1318_v17, %v1316_v14  ;;  %1190 = vmatmul.bf16.gmra.mxu2 %v905_v15  ;;  %1359 = vmatmul.bf16.gmra.mxu3 %v906_v16 }
 0x24f   :  { %v534_v19 = vpop.f32.mrf.mxu0  ;;  %v703_v20 = vpop.f32.mrf.mxu1 }
 0x250   :  { %2018 = vst [vmem:[%s2609_s5 + $0x90] sm:$0xff] %v1934_v18   ;;  %v535_v23 = vadd.f32 %v534_v19, %v2185_v47  ;;  %v704_v24 = vadd.f32 %v703_v20, %v2187_v48 }
 0x251   :  { %v1151_v21 = vpop.f32.mrf.mxu2  ;;  %v1320_v22 = vpop.f32.mrf.mxu3 }
 0x252   :  { %v1152_v27 = vadd.f32 %v2514_v3, %v1151_v21  ;;  %v835_v30 = vmax.f32 %v535_v23, 0.0  ;;  %v836_v33 = vmax.f32 %v704_v24, 0.0 }
 0x254   :  { %v1321_v37 = vadd.f32 %v1320_v22, %v1152_v27 }
 0x257   :  { %v536_v25 = vpop.f32.mrf.mxu0  ;;  %v705_v26 = vpop.f32.mrf.mxu1 }
 0x258   :  { %v537_v28 = vadd.f32 %v536_v25, %v2185_v47  ;;  %v706_v29 = vadd.f32 %v705_v26, %v2187_v48 }
 0x259   :  { %v1153_v31 = vpop.f32.mrf.mxu2  ;;  %v1322_v32 = vpop.f32.mrf.mxu3 }
 0x25a   :  { %v837_v34 = vmax.f32 %v537_v28, 0.0  ;;  %v838_v35 = vmax.f32 %v706_v29, 0.0  ;;  %v1154_v36 = vadd.f32 %v2514_v3, %v1153_v31 }
 0x25c   :  { %v907_v38 = vpack.c.bf16 %v837_v34, %v835_v30  ;;  %v908_v39 = vpack.c.bf16 %v838_v35, %v836_v33  ;;  %v1323_v40 = vadd.f32 %v1322_v32, %v1154_v36 }
 0x25e   :  { %v1939_v41 = vpack.c.bf16 %v1323_v40, %v1321_v37  ;;  %1195 = vmatmul.bf16.gmra.mxu2 %v907_v38  ;;  %1364 = vmatmul.bf16.gmra.mxu3 %v908_v39 }
 0x25f   :  { %v539_v42 = vpop.f32.mrf.mxu0  ;;  %v708_v43 = vpop.f32.mrf.mxu1 }
 0x260   :  { %2019 = vst [vmem:[%s2609_s5 + $0x98] sm:$0xff] %v1939_v41   ;;  %v540_v46 = vadd.f32 %v539_v42, %v2185_v47  ;;  %v709_v49 = vadd.f32 %v708_v43, %v2187_v48 }
 0x261   :  { %v1156_v44 = vpop.f32.mrf.mxu2  ;;  %v1325_v45 = vpop.f32.mrf.mxu3 }
 0x262   :  { %v1157_v52 = vadd.f32 %v2514_v3, %v1156_v44  ;;  %v839_v55 = vmax.f32 %v540_v46, 0.0  ;;  %v840_v58 = vmax.f32 %v709_v49, 0.0 }
 0x264   :  { %v1326_v63 = vadd.f32 %v1325_v45, %v1157_v52 }
 0x267   :  { %v541_v50 = vpop.f32.mrf.mxu0  ;;  %v710_v51 = vpop.f32.mrf.mxu1 }
 0x268   :  { %v542_v53 = vadd.f32 %v541_v50, %v2185_v47  ;;  %v711_v54 = vadd.f32 %v710_v51, %v2187_v48 }
 0x269   :  { %v1158_v56 = vpop.f32.mrf.mxu2  ;;  %v1327_v57 = vpop.f32.mrf.mxu3 }
 0x26a   :  { %v841_v59 = vmax.f32 %v542_v53, 0.0  ;;  %v842_v60 = vmax.f32 %v711_v54, 0.0  ;;  %v1159_v61 = vadd.f32 %v2514_v3, %v1158_v56 }
 0x26c   :  { %v909_v0 = vpack.c.bf16 %v841_v59, %v839_v55  ;;  %v910_v1 = vpack.c.bf16 %v842_v60, %v840_v58  ;;  %v1328_v62 = vadd.f32 %v1327_v57, %v1159_v61 }
 0x26e   :  { %v1944_v2 = vpack.c.bf16 %v1328_v62, %v1326_v63  ;;  %1200 = vmatmul.bf16.gmra.mxu2 %v909_v0  ;;  %1369 = vmatmul.bf16.gmra.mxu3 %v910_v1 }
 0x26f   :  { %v544_v4 = vpop.f32.mrf.mxu0  ;;  %v713_v5 = vpop.f32.mrf.mxu1 }
 0x270   :  { %2020 = vst [vmem:[%s2609_s5 + $0xa0] sm:$0xff] %v1944_v2   ;;  %v545_v8 = vadd.f32 %v544_v4, %v2185_v47  ;;  %v714_v9 = vadd.f32 %v713_v5, %v2187_v48 }
 0x271   :  { %v1161_v6 = vpop.f32.mrf.mxu2  ;;  %v1330_v7 = vpop.f32.mrf.mxu3 }
 0x272   :  { %v1162_v12 = vadd.f32 %v2514_v3, %v1161_v6  ;;  %v843_v15 = vmax.f32 %v545_v8, 0.0  ;;  %v844_v18 = vmax.f32 %v714_v9, 0.0 }
 0x274   :  { %v1331_v22 = vadd.f32 %v1330_v7, %v1162_v12 }
 0x277   :  { %v546_v10 = vpop.f32.mrf.mxu0  ;;  %v715_v11 = vpop.f32.mrf.mxu1 }
 0x278   :  { %v547_v13 = vadd.f32 %v546_v10, %v2185_v47  ;;  %v716_v14 = vadd.f32 %v715_v11, %v2187_v48 }
 0x279   :  { %v1163_v16 = vpop.f32.mrf.mxu2  ;;  %v1332_v17 = vpop.f32.mrf.mxu3 }
 0x27a   :  { %v845_v19 = vmax.f32 %v547_v13, 0.0  ;;  %v846_v20 = vmax.f32 %v716_v14, 0.0  ;;  %v1164_v21 = vadd.f32 %v2514_v3, %v1163_v16 }
 0x27c   :  { %v911_v23 = vpack.c.bf16 %v845_v19, %v843_v15  ;;  %v912_v24 = vpack.c.bf16 %v846_v20, %v844_v18  ;;  %v1333_v25 = vadd.f32 %v1332_v17, %v1164_v21 }
 0x27e   :  { %v1949_v26 = vpack.c.bf16 %v1333_v25, %v1331_v22  ;;  %1205 = vmatmul.bf16.gmra.mxu2 %v911_v23  ;;  %1374 = vmatmul.bf16.gmra.mxu3 %v912_v24 }
 0x27f   :  { %v549_v27 = vpop.f32.mrf.mxu0  ;;  %v718_v28 = vpop.f32.mrf.mxu1 }
 0x280   :  { %2021 = vst [vmem:[%s2609_s5 + $0xa8] sm:$0xff] %v1949_v26   ;;  %v550_v31 = vadd.f32 %v549_v27, %v2185_v47  ;;  %v719_v32 = vadd.f32 %v718_v28, %v2187_v48 }
 0x281   :  { %v1166_v29 = vpop.f32.mrf.mxu2  ;;  %v1335_v30 = vpop.f32.mrf.mxu3 }
 0x282   :  { %v1167_v35 = vadd.f32 %v2514_v3, %v1166_v29  ;;  %v847_v38 = vmax.f32 %v550_v31, 0.0  ;;  %v848_v41 = vmax.f32 %v719_v32, 0.0 }
 0x284   :  { %v1336_v45 = vadd.f32 %v1335_v30, %v1167_v35 }
 0x287   :  { %v551_v33 = vpop.f32.mrf.mxu0  ;;  %v720_v34 = vpop.f32.mrf.mxu1 }
 0x288   :  { %v552_v36 = vadd.f32 %v551_v33, %v2185_v47  ;;  %v721_v37 = vadd.f32 %v720_v34, %v2187_v48 }
 0x289   :  { %v1168_v39 = vpop.f32.mrf.mxu2  ;;  %v1337_v40 = vpop.f32.mrf.mxu3 }
 0x28a   :  { %v849_v42 = vmax.f32 %v552_v36, 0.0  ;;  %v850_v43 = vmax.f32 %v721_v37, 0.0  ;;  %v1169_v44 = vadd.f32 %v2514_v3, %v1168_v39 }
 0x28c   :  { %v913_v46 = vpack.c.bf16 %v849_v42, %v847_v38  ;;  %v914_v49 = vpack.c.bf16 %v850_v43, %v848_v41  ;;  %v1338_v50 = vadd.f32 %v1337_v40, %v1169_v44 }
 0x28e   :  { %v1954_v51 = vpack.c.bf16 %v1338_v50, %v1336_v45  ;;  %1210 = vmatmul.bf16.gmra.mxu2 %v913_v46  ;;  %1379 = vmatmul.bf16.gmra.mxu3 %v914_v49 }
 0x290   :  { %2022 = vst [vmem:[%s2609_s5 + $0xb0] sm:$0xff] %v1954_v51  }
 0x291   :  { %v1171_v47 = vpop.f32.mrf.mxu2  ;;  %v1340_v48 = vpop.f32.mrf.mxu3 }
 0x292   :  { %v1172_v52 = vadd.f32 %v2514_v3, %v1171_v47 }
 0x294   :  { %v1341_v56 = vadd.f32 %v1340_v48, %v1172_v52 }
 0x299   :  { %v1173_v53 = vpop.f32.mrf.mxu2  ;;  %v1342_v54 = vpop.f32.mrf.mxu3 }
 0x29a   :  { %v1174_v55 = vadd.f32 %v2514_v3, %v1173_v53 }
 0x29c   :  { %v1343_v57 = vadd.f32 %v1342_v54, %v1174_v55 }
 0x29e   :  { %v1959_v58 = vpack.c.bf16 %v1343_v57, %v1341_v56 }
 0x2a0   :  { %2023 = vst [vmem:[%s2609_s5 + $0xb8] sm:$0xff] %v1959_v58  }
 0x2a1   :  { %v1176_v59 = vpop.f32.mrf.mxu2  ;;  %v1345_v60 = vpop.f32.mrf.mxu3 }
 0x2a2   :  { %v1177_v61 = vadd.f32 %v2514_v3, %v1176_v59 }
 0x2a4   :  { %v1346_v62 = vadd.f32 %v1345_v60, %v1177_v61 }
 0x2a9   :  { %v1178_v63 = vpop.f32.mrf.mxu2  ;;  %v1347_v0 = vpop.f32.mrf.mxu3 }
 0x2aa   :  { %v1179_v1 = vadd.f32 %v2514_v3, %v1178_v63 }
 0x2ac   :  { %v1348_v2 = vadd.f32 %v1347_v0, %v1179_v1 }
 0x2ae   :  { %v1964_v4 = vpack.c.bf16 %v1348_v2, %v1346_v62 }
 0x2b0   :  { %2024 = vst [vmem:[%s2609_s5 + $0xc0] sm:$0xff] %v1964_v4  }
 0x2b1   :  { %v1181_v5 = vpop.f32.mrf.mxu2  ;;  %v1350_v6 = vpop.f32.mrf.mxu3 }
 0x2b2   :  { %v1182_v7 = vadd.f32 %v2514_v3, %v1181_v5 }
 0x2b4   :  { %v1351_v11 = vadd.f32 %v1350_v6, %v1182_v7 }
 0x2b9   :  { %v1183_v8 = vpop.f32.mrf.mxu2  ;;  %v1352_v9 = vpop.f32.mrf.mxu3 }
 0x2ba   :  { %v1184_v10 = vadd.f32 %v2514_v3, %v1183_v8 }
 0x2bc   :  { %v1353_v12 = vadd.f32 %v1352_v9, %v1184_v10 }
 0x2be   :  { %v1969_v13 = vpack.c.bf16 %v1353_v12, %v1351_v11 }
 0x2c0   :  { %2025 = vst [vmem:[%s2609_s5 + $0xc8] sm:$0xff] %v1969_v13  }
 0x2c1   :  { %v1186_v14 = vpop.f32.mrf.mxu2  ;;  %v1355_v15 = vpop.f32.mrf.mxu3 }
 0x2c2   :  { %v1187_v16 = vadd.f32 %v2514_v3, %v1186_v14 }
 0x2c4   :  { %v1356_v20 = vadd.f32 %v1355_v15, %v1187_v16 }
 0x2c9   :  { %v1188_v17 = vpop.f32.mrf.mxu2  ;;  %v1357_v18 = vpop.f32.mrf.mxu3 }
 0x2ca   :  { %v1189_v19 = vadd.f32 %v2514_v3, %v1188_v17 }
 0x2cc   :  { %v1358_v21 = vadd.f32 %v1357_v18, %v1189_v19 }
 0x2ce   :  { %v1974_v22 = vpack.c.bf16 %v1358_v21, %v1356_v20 }
 0x2d0   :  { %2026 = vst [vmem:[%s2609_s5 + $0xd0] sm:$0xff] %v1974_v22  }
 0x2d1   :  { %v1191_v23 = vpop.f32.mrf.mxu2  ;;  %v1360_v24 = vpop.f32.mrf.mxu3 }
 0x2d2   :  { %v1192_v25 = vadd.f32 %v2514_v3, %v1191_v23 }
 0x2d4   :  { %v1361_v29 = vadd.f32 %v1360_v24, %v1192_v25 }
 0x2d9   :  { %v1193_v26 = vpop.f32.mrf.mxu2  ;;  %v1362_v27 = vpop.f32.mrf.mxu3 }
 0x2da   :  { %v1194_v28 = vadd.f32 %v2514_v3, %v1193_v26 }
 0x2dc   :  { %v1363_v30 = vadd.f32 %v1362_v27, %v1194_v28 }
 0x2de   :  { %v1979_v31 = vpack.c.bf16 %v1363_v30, %v1361_v29 }
 0x2e0   :  { %2027 = vst [vmem:[%s2609_s5 + $0xd8] sm:$0xff] %v1979_v31  }
 0x2e1   :  { %v1196_v32 = vpop.f32.mrf.mxu2  ;;  %v1365_v33 = vpop.f32.mrf.mxu3 }
 0x2e2   :  { %v1197_v34 = vadd.f32 %v2514_v3, %v1196_v32 }
 0x2e4   :  { %v1366_v38 = vadd.f32 %v1365_v33, %v1197_v34 }
 0x2e9   :  { %v1198_v35 = vpop.f32.mrf.mxu2  ;;  %v1367_v36 = vpop.f32.mrf.mxu3 }
 0x2ea   :  { %v1199_v37 = vadd.f32 %v2514_v3, %v1198_v35 }
 0x2ec   :  { %v1368_v39 = vadd.f32 %v1367_v36, %v1199_v37 }
 0x2ee   :  { %v1984_v40 = vpack.c.bf16 %v1368_v39, %v1366_v38 }
 0x2f0   :  { %2028 = vst [vmem:[%s2609_s5 + $0xe0] sm:$0xff] %v1984_v40  }
 0x2f1   :  { %v1201_v41 = vpop.f32.mrf.mxu2  ;;  %v1370_v42 = vpop.f32.mrf.mxu3 }
 0x2f2   :  { %v1202_v43 = vadd.f32 %v2514_v3, %v1201_v41 }
 0x2f4   :  { %v1371_v49 = vadd.f32 %v1370_v42, %v1202_v43 }
 0x2f9   :  { %v1203_v44 = vpop.f32.mrf.mxu2  ;;  %v1372_v45 = vpop.f32.mrf.mxu3 }
 0x2fa   :  { %v1204_v46 = vadd.f32 %v2514_v3, %v1203_v44 }
 0x2fc   :  { %v1373_v50 = vadd.f32 %v1372_v45, %v1204_v46 }
 0x2fe   :  { %v1989_v51 = vpack.c.bf16 %v1373_v50, %v1371_v49 }
 0x300   :  { %2029 = vst [vmem:[%s2609_s5 + $0xe8] sm:$0xff] %v1989_v51  }
 0x301   :  { %v1206_v47 = vpop.f32.mrf.mxu2  ;;  %v1375_v48 = vpop.f32.mrf.mxu3 }
 0x302   :  { %v1207_v52 = vadd.f32 %v2514_v3, %v1206_v47 }
 0x304   :  { %v1376_v56 = vadd.f32 %v1375_v48, %v1207_v52 }
 0x309   :  { %v1208_v53 = vpop.f32.mrf.mxu2  ;;  %v1377_v54 = vpop.f32.mrf.mxu3 }
 0x30a   :  { %v1209_v55 = vadd.f32 %v2514_v3, %v1208_v53 }
 0x30c   :  { %v1378_v57 = vadd.f32 %v1377_v54, %v1209_v55 }
 0x30e   :  { %v1994_v58 = vpack.c.bf16 %v1378_v57, %v1376_v56 }
 0x310   :  { %2030 = vst [vmem:[%s2609_s5 + $0xf0] sm:$0xff] %v1994_v58  }
 0x311   :  { %v1211_v59 = vpop.f32.mrf.mxu2  ;;  %v1380_v60 = vpop.f32.mrf.mxu3 }
 0x312   :  { %v1212_v61 = vadd.f32 %v2514_v3, %v1211_v59 }
 0x314   :  { %v1381_v62 = vadd.f32 %v1380_v60, %v1212_v61 }
 0x319   :  { %v1213_v63 = vpop.f32.mrf.mxu2  ;;  %v1382_v1 = vpop.f32.mrf.mxu3 }
 0x31a   :  { %v1214_v0 = vadd.f32 %v2514_v3, %v1213_v63 }
 0x31c   :  { %v1383_v2 = vadd.f32 %v1382_v1, %v1214_v0 }
 0x31e   :  { %v1999_v4 = vpack.c.bf16 %v1383_v2, %v1381_v62 }
 0x320   :  { %2031 = vst [vmem:[%s2609_s5 + $0xf8] sm:$0xff] %v1999_v4  }

</bundles_post_ra>
